<compile_context>
chip_gen: v6e
topology: v6e:2x2x1
jax: 0.10.0
libtpu: 0.0.40
codegen_flags: <defaults>
</compile_context>

<pallas_src>
import jax
import jax.numpy as jnp
from jax.experimental import pallas as pl
from jax.experimental.pallas import tpu as pltpu


def _leaky_relu(x, slope=0.2):
    return jnp.where(x > 0, x, slope * x)


def encoder_fc_kernel(x_ref, w1_ref, b1_ref, w2_ref, b2_ref, w3_ref, b3_ref,
                      out_ref):
    # Cast x to the MXU operand dtype (bf16 by default) IN-KERNEL: keeps a
    # single HBM pass over x while feeding the MXU its native operand dtype.
    x = x_ref[...].astype(w1_ref.dtype)

    # layer 1: (tm, 1024) @ (1024, 256) + b1, leaky_relu(0.2)
    h1 = jnp.dot(x, w1_ref[...], preferred_element_type=jnp.float32)
    h1 = _leaky_relu(h1 + b1_ref[...])

    # layer 2: (tm, 256) @ (256, 64) + b2, leaky_relu(0.2)
    h2 = jnp.dot(h1.astype(w2_ref.dtype), w2_ref[...],
                 preferred_element_type=jnp.float32)
    h2 = _leaky_relu(h2 + b2_ref[...])

    # layer 3: (tm, 64) @ (64, 16) + b3
    h3 = jnp.dot(h2.astype(w3_ref.dtype), w3_ref[...],
                 preferred_element_type=jnp.float32)
    out_ref[...] = (h3 + b3_ref[...]).astype(out_ref.dtype)


def _round_up(x, m):
    return ((x + m - 1) // m) * m


def _pick_block_rows(n, max_rows):
    """Row-tile size.

    * large batches: 256-aligned (fills 256x256 v6e/v7x MXU, 128-aligned for
      v5e), capped at max_rows, kept to >= 2 grid steps so the 'parallel'
      axis can span both v7x TensorCores.
    * small batches: 16-aligned (bf16 packs 2 rows/sublane) with >= 2 steps
      when the batch allows; tiny batches use a single full-batch tile.
    """
    if n <= 16:
        return n                                     # single full-batch tile
    if n <= max_rows:
        return min(_round_up(pl.cdiv(n, 2), 16), max_rows)
    return min(_round_up(pl.cdiv(n, 2), 256), max_rows)


def encoder_fc(x, w1, b1, w2, b2, w3, b3, *, max_block_rows=512,
               matmul_dtype=jnp.bfloat16):
    """EncoderFC forward.

    x  : any shape whose elements flatten to (N, 1024)   (torch view(-1, 1024))
    w* : (in_features, out_features)     b* : (out_features,)
    matmul_dtype : MXU operand dtype (default bf16; accumulation and the
                   bias/activation epilogue are always f32 in-kernel).
                   Pass None to use the given weight/input dtypes as-is.
    Returns (N, 1, 16) float32.
    """
    d_in, d1 = w1.shape           # 1024, 256
    d2 = w2.shape[1]              # 64
    d_out = w3.shape[1]           # 16

    # Metadata-only reshape; NO dtype cast on x in the wrapper (that would be
    # an extra HBM read+write pass over the dominant input).
    x2 = x.reshape(-1, d_in)
    n = x2.shape[0]

    if matmul_dtype is not None:
        w1 = w1.astype(matmul_dtype)
        w2 = w2.astype(matmul_dtype)
        w3 = w3.astype(matmul_dtype)

    tm = _pick_block_rows(n, max_block_rows)
    grid = (pl.cdiv(n, tm),)      # no pad copy: trailing tile may be partial

    resident = lambda i: (0, 0)   # weights / biases: same block every step
    row_tile = lambda i: (i, 0)   # x / out: walk over row tiles

    flops = 2 * n * (d_in * d1 + d1 * d2 + d2 * d_out)
    bytes_accessed = (x2.size * x2.dtype.itemsize
                      + w1.size * w1.dtype.itemsize
                      + w2.size * w2.dtype.itemsize
                      + w3.size * w3.dtype.itemsize
                      + (b1.size + b2.size + b3.size) * 4
                      + n * d_out * 4)

    out = pl.pallas_call(
        encoder_fc_kernel,
        out_shape=jax.ShapeDtypeStruct((n, d_out), jnp.float32),
        grid_spec=pltpu.PrefetchScalarGridSpec(
            num_scalar_prefetch=0,
            grid=grid,
            in_specs=[
                pl.BlockSpec((tm, d_in), row_tile),
                pl.BlockSpec((d_in, d1), resident),
                pl.BlockSpec((1, d1), resident),
                pl.BlockSpec((d1, d2), resident),
                pl.BlockSpec((1, d2), resident),
                pl.BlockSpec((d2, d_out), resident),
                pl.BlockSpec((1, d_out), resident),
            ],
            out_specs=pl.BlockSpec((tm, d_out), row_tile),
        ),
        compiler_params=pltpu.CompilerParams(
            dimension_semantics=("parallel",)),
        cost_estimate=pl.CostEstimate(
            flops=flops, transcendentals=0, bytes_accessed=bytes_accessed),
    )(x2,
      w1, b1.reshape(1, d1).astype(jnp.float32),
      w2, b2.reshape(1, d2).astype(jnp.float32),
      w3, b3.reshape(1, d_out).astype(jnp.float32))

    return out.reshape(n, 1, d_out)


def _reference(x, w1, b1, w2, b2, w3, b3):
    h = x.reshape(-1, 1024)
    h = jnp.dot(h, w1) + b1
    h = jnp.where(h > 0, h, 0.2 * h)
    h = jnp.dot(h, w2) + b2
    h = jnp.where(h > 0, h, 0.2 * h)
    h = jnp.dot(h, w3) + b3
    return h.reshape(-1, 1, 16)


if __name__ == "__main__":
    # 48 single-channel 32x32 images -> view(-1, 1024) = (48, 1024).
    # tm = 32 here, so the grid has 2 steps ("parallel" axis exercised) and
    # the second tile is partial (16 valid rows), exercising the masked tail.
    B = 48
    key = jax.random.PRNGKey(0)
    k_x, k_w1, k_b1, k_w2, k_b2, k_w3, k_b3 = jax.random.split(key, 7)

    x = jax.random.normal(k_x, (B, 1, 32, 32), dtype=jnp.float32)

    # normal_init(mean=0, std=0.02)-style weights, stored (in, out); small
    # random biases to exercise the bias-add path.
    w1 = 0.02 * jax.random.normal(k_w1, (1024, 256), dtype=jnp.float32)
    b1 = 0.10 * jax.random.normal(k_b1, (256,), dtype=jnp.float32)
    w2 = 0.02 * jax.random.normal(k_w2, (256, 64), dtype=jnp.float32)
    b2 = 0.10 * jax.random.normal(k_b2, (64,), dtype=jnp.float32)
    w3 = 0.02 * jax.random.normal(k_w3, (64, 16), dtype=jnp.float32)
    b3 = 0.10 * jax.random.normal(k_b3, (16,), dtype=jnp.float32)

    ref = _reference(x, w1, b1, w2, b2, w3, b3)

    # f32 operand path: tight correctness check (tolerance allows differing
    # MXU f32-matmul decompositions between XLA and Mosaic).
    out_f32 = encoder_fc(x, w1, b1, w2, b2, w3, b3, matmul_dtype=None)
    out_f32 = jax.block_until_ready(out_f32)
    assert out_f32.shape == (B, 1, 16)
    assert jnp.allclose(out_f32, ref, atol=2e-3, rtol=2e-3)

    # Default path: bf16 MXU operands (f32 accumulate + f32 epilogue); looser
    # tolerance vs. the f32 reference.
    out = encoder_fc(x, w1, b1, w2, b2, w3, b3)
    out = jax.block_until_ready(out)
    assert out.shape == (B, 1, 16)
    assert jnp.allclose(out, ref, atol=3e-2, rtol=3e-2)

    print("KERNEL_OK")
</pallas_src>

<mosaic_0001>
module attributes {stable_mosaic.version = 11 : i64} {
  func.func @encoder_fc_kernel(%arg0: i32, %arg1: memref<32x1024xf32, #tpu.memory_space<vmem>>, %arg2: memref<1024x256xf32, #tpu.memory_space<vmem>>, %arg3: memref<1x256xf32, #tpu.memory_space<vmem>>, %arg4: memref<256x64xf32, #tpu.memory_space<vmem>>, %arg5: memref<1x64xf32, #tpu.memory_space<vmem>>, %arg6: memref<64x16xf32, #tpu.memory_space<vmem>>, %arg7: memref<1x16xf32, #tpu.memory_space<vmem>>, %arg8: memref<32x16xf32, #tpu.memory_space<vmem>>) attributes {dimension_semantics = [#tpu.dimension_semantics<parallel>], iteration_bounds = array<i64: 2>, scalar_prefetch = 0 : i64, scratch_operands = 0 : i64, tpu.core_type = #tpu.core_type<tc>, window_params = [{transform_indices = @transform_0, window_bounds = array<i64: 32, 1024>}, {pipeline_mode = #tpu.pipeline_mode<synchronous>, transform_indices = @transform_1, window_bounds = array<i64: 1024, 256>}, {pipeline_mode = #tpu.pipeline_mode<synchronous>, transform_indices = @transform_2, window_bounds = array<i64: 1, 256>}, {pipeline_mode = #tpu.pipeline_mode<synchronous>, transform_indices = @transform_3, window_bounds = array<i64: 256, 64>}, {pipeline_mode = #tpu.pipeline_mode<synchronous>, transform_indices = @transform_4, window_bounds = array<i64: 1, 64>}, {pipeline_mode = #tpu.pipeline_mode<synchronous>, transform_indices = @transform_5, window_bounds = array<i64: 64, 16>}, {pipeline_mode = #tpu.pipeline_mode<synchronous>, transform_indices = @transform_6, window_bounds = array<i64: 1, 16>}, {transform_indices = @transform_7, window_bounds = array<i64: 32, 16>}]} {
    %c0 = arith.constant 0 : index
    %c0_0 = arith.constant 0 : index
    %0 = vector.load %arg1[%c0, %c0_0] : memref<32x1024xf32, #tpu.memory_space<vmem>>, vector<32x1024xf32>
    %c0_1 = arith.constant 0 : index
    %c0_2 = arith.constant 0 : index
    %1 = vector.load %arg2[%c0_1, %c0_2] : memref<1024x256xf32, #tpu.memory_space<vmem>>, vector<1024x256xf32>
    %cst = arith.constant dense<0.000000e+00> : vector<32x256xf32>
    %2 = tpu.matmul %0, %1, %cst {dimension_numbers = #tpu.dot_dimension_numbers<[1], [0], [0], [1], [0, 0, 1, 1], [], []>} : vector<32x1024xf32>, vector<1024x256xf32>, vector<32x256xf32> -> vector<32x256xf32>
    %c0_3 = arith.constant 0 : index
    %c0_4 = arith.constant 0 : index
    %3 = vector.load %arg3[%c0_3, %c0_4] : memref<1x256xf32, #tpu.memory_space<vmem>>, vector<1x256xf32>
    %4 = vector.broadcast %3 : vector<1x256xf32> to vector<32x256xf32>
    %5 = arith.addf %2, %4 : vector<32x256xf32>
    %cst_5 = arith.constant 0.000000e+00 : f32
    %6 = vector.broadcast %cst_5 : f32 to vector<32x256xf32>
    %7 = arith.cmpf ogt, %5, %6 : vector<32x256xf32>
    %cst_6 = arith.constant 2.000000e-01 : f32
    %8 = vector.broadcast %cst_6 : f32 to vector<32x256xf32>
    %9 = arith.mulf %8, %5 : vector<32x256xf32>
    %10 = arith.select %7, %5, %9 : vector<32x256xi1>, vector<32x256xf32>
    %c0_7 = arith.constant 0 : index
    %c0_8 = arith.constant 0 : index
    %11 = vector.load %arg4[%c0_7, %c0_8] : memref<256x64xf32, #tpu.memory_space<vmem>>, vector<256x64xf32>
    %cst_9 = arith.constant dense<0.000000e+00> : vector<32x64xf32>
    %12 = tpu.matmul %10, %11, %cst_9 {dimension_numbers = #tpu.dot_dimension_numbers<[1], [0], [0], [1], [0, 0, 1, 1], [], []>} : vector<32x256xf32>, vector<256x64xf32>, vector<32x64xf32> -> vector<32x64xf32>
    %c0_10 = arith.constant 0 : index
    %c0_11 = arith.constant 0 : index
    %13 = vector.load %arg5[%c0_10, %c0_11] : memref<1x64xf32, #tpu.memory_space<vmem>>, vector<1x64xf32>
    %14 = vector.broadcast %13 : vector<1x64xf32> to vector<32x64xf32>
    %15 = arith.addf %12, %14 : vector<32x64xf32>
    %cst_12 = arith.constant 0.000000e+00 : f32
    %16 = vector.broadcast %cst_12 : f32 to vector<32x64xf32>
    %17 = arith.cmpf ogt, %15, %16 : vector<32x64xf32>
    %cst_13 = arith.constant 2.000000e-01 : f32
    %18 = vector.broadcast %cst_13 : f32 to vector<32x64xf32>
    %19 = arith.mulf %18, %15 : vector<32x64xf32>
    %20 = arith.select %17, %15, %19 : vector<32x64xi1>, vector<32x64xf32>
    %c0_14 = arith.constant 0 : index
    %c0_15 = arith.constant 0 : index
    %21 = vector.load %arg6[%c0_14, %c0_15] : memref<64x16xf32, #tpu.memory_space<vmem>>, vector<64x16xf32>
    %cst_16 = arith.constant dense<0.000000e+00> : vector<32x16xf32>
    %22 = tpu.matmul %20, %21, %cst_16 {dimension_numbers = #tpu.dot_dimension_numbers<[1], [0], [0], [1], [0, 0, 1, 1], [], []>} : vector<32x64xf32>, vector<64x16xf32>, vector<32x16xf32> -> vector<32x16xf32>
    %c0_17 = arith.constant 0 : index
    %c0_18 = arith.constant 0 : index
    %23 = vector.load %arg7[%c0_17, %c0_18] : memref<1x16xf32, #tpu.memory_space<vmem>>, vector<1x16xf32>
    %24 = vector.broadcast %23 : vector<1x16xf32> to vector<32x16xf32>
    %25 = arith.addf %22, %24 : vector<32x16xf32>
    %c0_19 = arith.constant 0 : index
    %c0_20 = arith.constant 0 : index
    %26 = vector.load %arg8[%c0_19, %c0_20] : memref<32x16xf32, #tpu.memory_space<vmem>>, vector<32x16xf32>
    tpu.vector_store %arg8[%c0_19, %c0_20], %25 {strides = array<i32>} : memref<32x16xf32, #tpu.memory_space<vmem>>, vector<32x16xf32>,
    return
  }
  func.func @transform_0(%arg0: i32) -> (i32, i32) {
    %c0_i32 = arith.constant 0 : i32
    %c0_i32_0 = arith.constant 0 : i32
    return %arg0, %c0_i32 : i32, i32
  }
  func.func @transform_1(%arg0: i32) -> (i32, i32) {
    %c0_i32 = arith.constant 0 : i32
    %c0_i32_0 = arith.constant 0 : i32
    %c0_i32_1 = arith.constant 0 : i32
    return %c0_i32, %c0_i32_0 : i32, i32
  }
  func.func @transform_2(%arg0: i32) -> (i32, i32) {
    %c0_i32 = arith.constant 0 : i32
    %c0_i32_0 = arith.constant 0 : i32
    %c0_i32_1 = arith.constant 0 : i32
    return %c0_i32, %c0_i32_0 : i32, i32
  }
  func.func @transform_3(%arg0: i32) -> (i32, i32) {
    %c0_i32 = arith.constant 0 : i32
    %c0_i32_0 = arith.constant 0 : i32
    %c0_i32_1 = arith.constant 0 : i32
    return %c0_i32, %c0_i32_0 : i32, i32
  }
  func.func @transform_4(%arg0: i32) -> (i32, i32) {
    %c0_i32 = arith.constant 0 : i32
    %c0_i32_0 = arith.constant 0 : i32
    %c0_i32_1 = arith.constant 0 : i32
    return %c0_i32, %c0_i32_0 : i32, i32
  }
  func.func @transform_5(%arg0: i32) -> (i32, i32) {
    %c0_i32 = arith.constant 0 : i32
    %c0_i32_0 = arith.constant 0 : i32
    %c0_i32_1 = arith.constant 0 : i32
    return %c0_i32, %c0_i32_0 : i32, i32
  }
  func.func @transform_6(%arg0: i32) -> (i32, i32) {
    %c0_i32 = arith.constant 0 : i32
    %c0_i32_0 = arith.constant 0 : i32
    %c0_i32_1 = arith.constant 0 : i32
    return %c0_i32, %c0_i32_0 : i32, i32
  }
  func.func @transform_7(%arg0: i32) -> (i32, i32) {
    %c0_i32 = arith.constant 0 : i32
    %c0_i32_0 = arith.constant 0 : i32
    return %arg0, %c0_i32 : i32, i32
  }
}

</mosaic_0001>

<bundles_post_ra>
// kernel: tpu_custom_call.1
= control target key start
LH: loop header
LB: loop body
LE: loop exit
PB: predicated region body
PF: predicated region fallthrough
CT: control target
= control target key end

     0   :  { %12 = vsyncpa [#allocation3], 0  ;;  %s1874_s24 = smov 0   ;;  %s1876_s25 = smov 0   ;;  %s2164_s0 = inlined_call_operand.vmem [shape: f32[48,1024], index: 0, kind: input, shape index: {}]   ;;  %s2165_s1 = inlined_call_operand.hbm [shape: f32[1024,256], index: 1, kind: input, shape index: {}]   ;;  %s2166_s2 = inlined_call_operand.vmem [shape: f32[1,256], index: 2, kind: input, shape index: {}]   ;;  %s2167_s3 = inlined_call_operand.vmem [shape: f32[256,64], index: 3, kind: input, shape index: {}]   ;;  %s2168_s4 = inlined_call_operand.vmem [shape: f32[1,64], index: 4, kind: input, shape index: {}]   ;;  %s2169_s5 = inlined_call_operand.vmem [shape: f32[64,16], index: 5, kind: input, shape index: {}]   ;;  %s2170_s6 = inlined_call_operand.vmem [shape: f32[1,16], index: 6, kind: input, shape index: {}]   ;;  %s2171_s7 = inlined_call_operand.vmem [shape: f32[48,16], index: 7, kind: output, shape index: {}]  }
   0x1   :  { %s1878_s26 = smov 0  }
   0x2 LB: > { %s1887_s27 = sadd.s32 4294967295, %s1797_s26   ;;  %s1889_s28 = sadd.s32 1, %s1797_s26   ;;  %s1797_s26 = sphi %s1878_s26, %s2179_s26   ;;  %s1793_s25 = sphi %s1876_s25, %s2178_s25   ;;  %s1789_s24 = sphi %s1874_s24, %s2177_s24  }
   0x3   : > { %s174_s29 = ssub.s32 %s1797_s26, %s1889_s28  ;;  %s177_s30 = sadd.s32 1, %s1793_s25 }
   0x4   : > { %p175_p0 = scmp.eq.s32.totalorder %s174_s29, 0  ;;  %p187_p1 = scmp.ne.s32.totalorder %s1793_s25, %s1789_s24 }
   0x5   : > { %p188_p2 = scmp.eq.s32.totalorder %s1887_s27, 1  ;;  %p1498_p3 = scmp.ge.s32.totalorder %s1797_s26, 1 }
   0x6   : > { %s1897_s8 = scalar_select %p175_p0, %s1793_s25, %s177_s30  }
   0x7   : > { %p1899_p4 = por %p188_p2, %p187_p1  ;;  %p201_p5 = scmp.lt.s32.totalorder %s1797_s26, 3 }
   0x8   : > { %p1620_p6 = scmp.eq.s32.totalorder %s1887_s27, 0  ;;  %s1831_s11 = smov [#allocation2]  }
   0x9   : > { %p1904_p7 = pnand %p1498_p3, %p201_p5  ;;  %s213_s12 = sshll.u32 %s1831_s11, 4  ;;  %s214_s12 = int_to_ptr.vmem [resolvable:$true] %s213_s12 }
   0xa   : > { %s1724_s13 = scalar_lea.vmem %s214_s12, 32768  ;;  %p1732_p0 = scmp.lt.s32.totalorder %s214_s12, %s214_s12 }
   0xb   : > { %p1616_p8 = pneg %p1904_p7  ;;  %p1725_p11 = scmp.ne.s32.totalorder %s214_s12, %s1724_s13 }
   0xc   : > { %p1733_p1 = scmp.lt.s32.totalorder %s1724_s13, %s1724_s13 }
   0xd   : > { %p1617_p9 = pnand %p1620_p6, %p1616_p8 }
   0xe   : > { %p1734_p2 = por %p1733_p1, %p1732_p0 }
   0xf   : > { %p1715_p10 = pneg %p1617_p9 }
  0x11   : > { %p1727_p12 = pnand %p1725_p11, %p1715_p10 }
  0x13   : > { %p1728_p13 = pneg %p1727_p12 }
  0x15   : > { %p1735_p3 = pnand %p1734_p2, %p1728_p13 }
  0x17   : > { %1738 = shalt.err (!%p1735_p3)
}
  0x18   : > { %s1832_s14 = smov 256   ;;  %s1833_s15 = smov 16  }
  0x19   : > { %1619 = dma.hbm_to_vmem [thread:$0]  (!%p1617_p9), %s2165_s1, 32768, %s214_s12, [#allocation3], %s1832_s14, %s1832_s14, %s1833_s15  }
  0x1a   : > { %264 = sbr.rel (%p1904_p7) target bundleno = 824 (0x338), region = 48 }
  0x1f   : > { %1784 = dma.done.wait (%p1620_p6), [#allocation3], 32768  }
  0x20   : > { %1786 = vsyncadd (%p1620_p6), [#allocation3], 4294934528  ;;  %v386_v0 = vld [vmem:[#allocation2 + $0xf8] sm:$0xff]  ;;  %v385_v2 = vld [vmem:[#allocation2 + $0xf0] sm:$0xff]  ;;  %s1922_s18 = sshll.u32 %s1887_s27, 2  ;;  %vm1154_vm9 = vcmask 523264  }
  0x21   : > { %v450_v1 = vld [vmem:[#allocation2 + $0x2f8] sm:$0xff]  ;;  %623 = vmatprep.subr.mxu0 %v386_v0  ;;  %v449_v3 = vld [vmem:[#allocation2 + $0x2f0] sm:$0xff]  ;;  %v384_v4 = vld [vmem:[#allocation2 + $0xe8] sm:$0xff]  ;;  %p307_p5 = scmp.lt.s32.totalorder %s1922_s18, 5  ;;  %s298_s11 = sand.u32 1, %s1789_s24   ;;  %vm1252_vm13 = vcmask 130048  }
  0x22   : > { %712 = vmatprep.subr.mxu1 %v450_v1  ;;  %v448_v5 = vld [vmem:[#allocation2 + $0x2e8] sm:$0xff]  ;;  %624 = vmatpush1.msra.mxu0 %v385_v2  ;;  %v383_v6 = vld [vmem:[#allocation2 + $0xe0] sm:$0xff]  ;;  %v382_v8 = vld [vmem:[#allocation2 + $0xd8] sm:$0xff]  ;;  %s1503_s12 = sshll.u32 %s298_s11, 5  ;;  %s1265_s24 = ssub.s32 (%p1899_p4), 6, %s1922_s18 }
  0x23   : > { %713 = vmatpush1.msra.mxu1 %v449_v3  ;;  %v447_v7 = vld [vmem:[#allocation2 + $0x2e0] sm:$0xff]  ;;  %625 = vmatprep.subr.mxu0 %v384_v4  ;;  %v446_v9 = vld [vmem:[#allocation2 + $0x2d8] sm:$0xff]  ;;  %v381_v10 = vld [vmem:[#allocation2 + $0xd0] sm:$0xff]  ;;  %s1928_s19 = scalar_select %p307_p5, %s1922_s18, 5 }
  0x24   : > { %714 = vmatprep.subr.mxu1 %v448_v5  ;;  %v445_v11 = vld [vmem:[#allocation2 + $0x2d0] sm:$0xff]  ;;  %626 = vmatpush1.msra.mxu0 %v383_v6  ;;  %v380_v12 = vld [vmem:[#allocation2 + $0xc8] sm:$0xff]  ;;  %v379_v14 = vld [vmem:[#allocation2 + $0xc0] sm:$0xff]  ;;  %s2102_s15 = scalar_lea.vmem [#allocation4], %s1503_s12   ;;  %s1531_s16 = sshll.u32 (%p1899_p4), %s1887_s27, 5 }
  0x25   : > { %715 = vmatpush1.msra.mxu1 %v447_v7  ;;  %v444_v13 = vld [vmem:[#allocation2 + $0x2c8] sm:$0xff]  ;;  %627 = vmatprep.subr.mxu0 %v382_v8  ;;  %v443_v15 = vld [vmem:[#allocation2 + $0x2c0] sm:$0xff]  ;;  %v378_v16 = vld [vmem:[#allocation2 + $0xb8] sm:$0xff]  ;;  %s1530_s20 = sshll.u32 %s1928_s19, 6  ;;  %p1266_p6 = scmp.lt.s32.totalorder (%p1899_p4), %s1265_s24, 4 }
  0x26   : > { %716 = vmatprep.subr.mxu1 %v446_v9  ;;  %628 = vmatpush1.msra.mxu0 %v381_v10  ;;  %v442_v17 = vld [vmem:[#allocation2 + $0x2b8] sm:$0xff]  ;;  %v377_v18 = vld [vmem:[#allocation2 + $0xb0] sm:$0xff]  ;;  %v376_v20 = vld [vmem:[#allocation2 + $0xa8] sm:$0xff]  ;;  %s1934_s23 = scalar_lea.vmem %s2164_s0, %s1530_s20  ;;  %s2115_s20 = scalar_lea.vmem (%p1899_p4), %s2171_s7, %s1531_s16  }
  0x27   : > { %717 = vmatpush1.msra.mxu1 %v445_v11  ;;  %629 = vmatprep.subr.mxu0 %v380_v12  ;;  %v441_v19 = vld [vmem:[#allocation2 + $0x2b0] sm:$0xff]  ;;  %v440_v21 = vld [vmem:[#allocation2 + $0x2a8] sm:$0xff]  ;;  %v375_v22 = vld [vmem:[#allocation2 + $0xa0] sm:$0xff] }
  0x28   : > { %718 = vmatprep.subr.mxu1 %v444_v13  ;;  %630 = vmatpush1.msra.mxu0 %v379_v14  ;;  %v439_v23 = vld [vmem:[#allocation2 + $0x2a0] sm:$0xff]  ;;  %v374_v24 = vld [vmem:[#allocation2 + $0x98] sm:$0xff]  ;;  %v373_v26 = vld [vmem:[#allocation2 + $0x90] sm:$0xff] }
  0x29   : > { %719 = vmatpush1.msra.mxu1 %v443_v15  ;;  %631 = vmatprep.subr.mxu0 %v378_v16  ;;  %v438_v25 = vld [vmem:[#allocation2 + $0x298] sm:$0xff]  ;;  %v437_v27 = vld [vmem:[#allocation2 + $0x290] sm:$0xff]  ;;  %v372_v28 = vld [vmem:[#allocation2 + $0x88] sm:$0xff] }
  0x2a   : > { %720 = vmatprep.subr.mxu1 %v442_v17  ;;  %632 = vmatpush1.msra.mxu0 %v377_v18  ;;  %v436_v29 = vld [vmem:[#allocation2 + $0x288] sm:$0xff]  ;;  %v371_v30 = vld [vmem:[#allocation2 + $0x80] sm:$0xff]  ;;  %v370_v32 = vld [vmem:[#allocation2 + $0x78] sm:$0xff] }
  0x2b   : > { %721 = vmatpush1.msra.mxu1 %v441_v19  ;;  %633 = vmatprep.subr.mxu0 %v376_v20  ;;  %v435_v31 = vld [vmem:[#allocation2 + $0x280] sm:$0xff]  ;;  %v434_v33 = vld [vmem:[#allocation2 + $0x278] sm:$0xff]  ;;  %v369_v34 = vld [vmem:[#allocation2 + $0x70] sm:$0xff] }
  0x2c   : > { %722 = vmatprep.subr.mxu1 %v440_v21  ;;  %634 = vmatpush1.msra.mxu0 %v375_v22  ;;  %v433_v35 = vld [vmem:[#allocation2 + $0x270] sm:$0xff]  ;;  %v368_v36 = vld [vmem:[#allocation2 + $0x68] sm:$0xff]  ;;  %v367_v38 = vld [vmem:[#allocation2 + $0x60] sm:$0xff] }
  0x2d   : > { %723 = vmatpush1.msra.mxu1 %v439_v23  ;;  %635 = vmatprep.subr.mxu0 %v374_v24  ;;  %v432_v37 = vld [vmem:[#allocation2 + $0x268] sm:$0xff]  ;;  %v431_v39 = vld [vmem:[#allocation2 + $0x260] sm:$0xff]  ;;  %v366_v40 = vld [vmem:[#allocation2 + $0x58] sm:$0xff] }
  0x2e   : > { %724 = vmatprep.subr.mxu1 %v438_v25  ;;  %636 = vmatpush1.msra.mxu0 %v373_v26  ;;  %v430_v41 = vld [vmem:[#allocation2 + $0x258] sm:$0xff]  ;;  %v365_v42 = vld [vmem:[#allocation2 + $0x50] sm:$0xff]  ;;  %v364_v44 = vld [vmem:[#allocation2 + $0x48] sm:$0xff] }
  0x2f   : > { %725 = vmatpush1.msra.mxu1 %v437_v27  ;;  %637 = vmatprep.subr.mxu0 %v372_v28  ;;  %v429_v43 = vld [vmem:[#allocation2 + $0x250] sm:$0xff]  ;;  %v428_v45 = vld [vmem:[#allocation2 + $0x248] sm:$0xff]  ;;  %v363_v46 = vld [vmem:[#allocation2 + $0x40] sm:$0xff] }
  0x30   : > { %726 = vmatprep.subr.mxu1 %v436_v29  ;;  %638 = vmatpush1.msra.mxu0 %v371_v30  ;;  %v427_v47 = vld [vmem:[#allocation2 + $0x240] sm:$0xff]  ;;  %v362_v48 = vld [vmem:[#allocation2 + $0x38] sm:$0xff]  ;;  %v361_v50 = vld [vmem:[#allocation2 + $0x30] sm:$0xff] }
  0x31   : > { %727 = vmatpush1.msra.mxu1 %v435_v31  ;;  %639 = vmatprep.subr.mxu0 %v370_v32  ;;  %v426_v49 = vld [vmem:[#allocation2 + $0x238] sm:$0xff]  ;;  %v425_v51 = vld [vmem:[#allocation2 + $0x230] sm:$0xff]  ;;  %v360_v52 = vld [vmem:[#allocation2 + $0x28] sm:$0xff] }
  0x32   : > { %728 = vmatprep.subr.mxu1 %v434_v33  ;;  %640 = vmatpush1.msra.mxu0 %v369_v34  ;;  %v424_v53 = vld [vmem:[#allocation2 + $0x228] sm:$0xff]  ;;  %v359_v54 = vld [vmem:[#allocation2 + $0x20] sm:$0xff]  ;;  %v358_v56 = vld [vmem:[#allocation2 + $0x18] sm:$0xff] }
  0x33   : > { %729 = vmatpush1.msra.mxu1 %v433_v35  ;;  %641 = vmatprep.subr.mxu0 %v368_v36  ;;  %v423_v55 = vld [vmem:[#allocation2 + $0x220] sm:$0xff]  ;;  %v422_v57 = vld [vmem:[#allocation2 + $0x218] sm:$0xff]  ;;  %v357_v58 = vld [vmem:[#allocation2 + $0x10] sm:$0xff] }
  0x34   : > { %730 = vmatprep.subr.mxu1 %v432_v37  ;;  %642 = vmatpush1.msra.mxu0 %v367_v38  ;;  %v421_v59 = vld [vmem:[#allocation2 + $0x210] sm:$0xff]  ;;  %v356_v60 = vld [vmem:[#allocation2 + $0x8] sm:$0xff]  ;;  %v355_v62 = vld [vmem:[#allocation2] sm:$0xff] }
  0x35   : > { %731 = vmatpush1.msra.mxu1 %v431_v39  ;;  %643 = vmatprep.subr.mxu0 %v366_v40  ;;  %v420_v61 = vld [vmem:[#allocation2 + $0x208] sm:$0xff]  ;;  %v419_v63 = vld [vmem:[#allocation2 + $0x200] sm:$0xff]  ;;  %v418_v0 = vld [vmem:[#allocation2 + $0x1f8] sm:$0xff] }
  0x36   : > { %732 = vmatprep.subr.mxu1 %v430_v41  ;;  %644 = vmatpush1.msra.mxu0 %v365_v42  ;;  %v482_v1 = vld [vmem:[#allocation2 + $0x3f8] sm:$0xff]  ;;  %v417_v2 = vld [vmem:[#allocation2 + $0x1f0] sm:$0xff]  ;;  %v416_v4 = vld [vmem:[#allocation2 + $0x1e8] sm:$0xff] }
  0x37   : > { %733 = vmatpush1.msra.mxu1 %v429_v43  ;;  %645 = vmatprep.subr.mxu0 %v364_v44  ;;  %v481_v3 = vld [vmem:[#allocation2 + $0x3f0] sm:$0xff]  ;;  %v480_v5 = vld [vmem:[#allocation2 + $0x3e8] sm:$0xff]  ;;  %v415_v6 = vld [vmem:[#allocation2 + $0x1e0] sm:$0xff] }
  0x38   : > { %734 = vmatprep.subr.mxu1 %v428_v45  ;;  %646 = vmatpush1.msra.mxu0 %v363_v46  ;;  %v479_v7 = vld [vmem:[#allocation2 + $0x3e0] sm:$0xff]  ;;  %v414_v8 = vld [vmem:[#allocation2 + $0x1d8] sm:$0xff]  ;;  %v413_v10 = vld [vmem:[#allocation2 + $0x1d0] sm:$0xff] }
  0x39   : > { %735 = vmatpush1.msra.mxu1 %v427_v47  ;;  %647 = vmatprep.subr.mxu0 %v362_v48  ;;  %v478_v9 = vld [vmem:[#allocation2 + $0x3d8] sm:$0xff]  ;;  %v477_v11 = vld [vmem:[#allocation2 + $0x3d0] sm:$0xff]  ;;  %v412_v12 = vld [vmem:[#allocation2 + $0x1c8] sm:$0xff] }
  0x3a   : > { %736 = vmatprep.subr.mxu1 %v426_v49  ;;  %648 = vmatpush1.msra.mxu0 %v361_v50  ;;  %v476_v13 = vld [vmem:[#allocation2 + $0x3c8] sm:$0xff]  ;;  %v411_v14 = vld [vmem:[#allocation2 + $0x1c0] sm:$0xff]  ;;  %v410_v16 = vld [vmem:[#allocation2 + $0x1b8] sm:$0xff] }
  0x3b   : > { %737 = vmatpush1.msra.mxu1 %v425_v51  ;;  %649 = vmatprep.subr.mxu0 %v360_v52  ;;  %v475_v15 = vld [vmem:[#allocation2 + $0x3c0] sm:$0xff]  ;;  %v474_v17 = vld [vmem:[#allocation2 + $0x3b8] sm:$0xff]  ;;  %v409_v18 = vld [vmem:[#allocation2 + $0x1b0] sm:$0xff] }
  0x3c   : > { %738 = vmatprep.subr.mxu1 %v424_v53  ;;  %650 = vmatpush1.msra.mxu0 %v359_v54  ;;  %v473_v19 = vld [vmem:[#allocation2 + $0x3b0] sm:$0xff]  ;;  %v408_v20 = vld [vmem:[#allocation2 + $0x1a8] sm:$0xff]  ;;  %v407_v22 = vld [vmem:[#allocation2 + $0x1a0] sm:$0xff] }
  0x3d   : > { %739 = vmatpush1.msra.mxu1 %v423_v55  ;;  %651 = vmatprep.subr.mxu0 %v358_v56  ;;  %v472_v21 = vld [vmem:[#allocation2 + $0x3a8] sm:$0xff]  ;;  %v471_v23 = vld [vmem:[#allocation2 + $0x3a0] sm:$0xff]  ;;  %v406_v24 = vld [vmem:[#allocation2 + $0x198] sm:$0xff] }
  0x3e   : > { %740 = vmatprep.subr.mxu1 %v422_v57  ;;  %652 = vmatpush1.msra.mxu0 %v357_v58  ;;  %v470_v25 = vld [vmem:[#allocation2 + $0x398] sm:$0xff]  ;;  %v405_v26 = vld [vmem:[#allocation2 + $0x190] sm:$0xff]  ;;  %v404_v28 = vld [vmem:[#allocation2 + $0x188] sm:$0xff] }
  0x3f   : > { %741 = vmatpush1.msra.mxu1 %v421_v59  ;;  %653 = vmatprep.subr.mxu0 %v356_v60  ;;  %v469_v27 = vld [vmem:[#allocation2 + $0x390] sm:$0xff]  ;;  %v468_v29 = vld [vmem:[#allocation2 + $0x388] sm:$0xff]  ;;  %v403_v30 = vld [vmem:[#allocation2 + $0x180] sm:$0xff] }
  0x40   : > { %742 = vmatprep.subr.mxu1 %v420_v61  ;;  %654 = vmatpush1.msra.mxu0 %v355_v62  ;;  %v467_v31 = vld [vmem:[#allocation2 + $0x380] sm:$0xff]  ;;  %v402_v32 = vld [vmem:[#allocation2 + $0x178] sm:$0xff]  ;;  %v401_v34 = vld [vmem:[#allocation2 + $0x170] sm:$0xff] }
  0x41   : > { %743 = vmatpush1.msra.mxu1 %v419_v63  ;;  %655 = vmatprep.subr.mxu0 %v418_v0  ;;  %v466_v33 = vld [vmem:[#allocation2 + $0x378] sm:$0xff]  ;;  %v465_v35 = vld [vmem:[#allocation2 + $0x370] sm:$0xff]  ;;  %v400_v36 = vld [vmem:[#allocation2 + $0x168] sm:$0xff] }
  0x42   : > { %744 = vmatprep.subr.mxu1 %v482_v1  ;;  %656 = vmatpush2.msra.mxu0 %v417_v2  ;;  %v464_v37 = vld [vmem:[#allocation2 + $0x368] sm:$0xff]  ;;  %v399_v38 = vld [vmem:[#allocation2 + $0x160] sm:$0xff]  ;;  %v398_v40 = vld [vmem:[#allocation2 + $0x158] sm:$0xff] }
  0x43   : > { %745 = vmatpush2.msra.mxu1 %v481_v3  ;;  %657 = vmatprep.subr.mxu0 %v416_v4  ;;  %v463_v39 = vld [vmem:[#allocation2 + $0x360] sm:$0xff]  ;;  %v462_v41 = vld [vmem:[#allocation2 + $0x358] sm:$0xff]  ;;  %v397_v42 = vld [vmem:[#allocation2 + $0x150] sm:$0xff] }
  0x44   : > { %746 = vmatprep.subr.mxu1 %v480_v5  ;;  %658 = vmatpush2.msra.mxu0 %v415_v6  ;;  %v461_v43 = vld [vmem:[#allocation2 + $0x350] sm:$0xff]  ;;  %v396_v44 = vld [vmem:[#allocation2 + $0x148] sm:$0xff]  ;;  %v395_v46 = vld [vmem:[#allocation2 + $0x140] sm:$0xff] }
  0x45   : > { %747 = vmatpush2.msra.mxu1 %v479_v7  ;;  %659 = vmatprep.subr.mxu0 %v414_v8  ;;  %v460_v45 = vld [vmem:[#allocation2 + $0x348] sm:$0xff]  ;;  %v459_v47 = vld [vmem:[#allocation2 + $0x340] sm:$0xff]  ;;  %v394_v48 = vld [vmem:[#allocation2 + $0x138] sm:$0xff] }
  0x46   : > { %748 = vmatprep.subr.mxu1 %v478_v9  ;;  %660 = vmatpush2.msra.mxu0 %v413_v10  ;;  %v458_v49 = vld [vmem:[#allocation2 + $0x338] sm:$0xff]  ;;  %v393_v50 = vld [vmem:[#allocation2 + $0x130] sm:$0xff]  ;;  %v392_v52 = vld [vmem:[#allocation2 + $0x128] sm:$0xff] }
  0x47   : > { %749 = vmatpush2.msra.mxu1 %v477_v11  ;;  %661 = vmatprep.subr.mxu0 %v412_v12  ;;  %v457_v51 = vld [vmem:[#allocation2 + $0x330] sm:$0xff]  ;;  %v456_v53 = vld [vmem:[#allocation2 + $0x328] sm:$0xff]  ;;  %v391_v54 = vld [vmem:[#allocation2 + $0x120] sm:$0xff] }
  0x48   : > { %750 = vmatprep.subr.mxu1 %v476_v13  ;;  %662 = vmatpush2.msra.mxu0 %v411_v14  ;;  %v455_v55 = vld [vmem:[#allocation2 + $0x320] sm:$0xff]  ;;  %v390_v56 = vld [vmem:[#allocation2 + $0x118] sm:$0xff]  ;;  %v389_v58 = vld [vmem:[#allocation2 + $0x110] sm:$0xff] }
  0x49   : > { %751 = vmatpush2.msra.mxu1 %v475_v15  ;;  %663 = vmatprep.subr.mxu0 %v410_v16  ;;  %v454_v57 = vld [vmem:[#allocation2 + $0x318] sm:$0xff]  ;;  %v453_v59 = vld [vmem:[#allocation2 + $0x310] sm:$0xff]  ;;  %v388_v60 = vld [vmem:[#allocation2 + $0x108] sm:$0xff] }
  0x4a   : > { %752 = vmatprep.subr.mxu1 %v474_v17  ;;  %664 = vmatpush2.msra.mxu0 %v409_v18  ;;  %v452_v61 = vld [vmem:[#allocation2 + $0x308] sm:$0xff]  ;;  %v387_v62 = vld [vmem:[#allocation2 + $0x100] sm:$0xff]  ;;  %v326_v2 = vld [vmem:[%s1934_s23 + $0x18] sm:$0xff] }
  0x4b   : > { %753 = vmatpush2.msra.mxu1 %v473_v19  ;;  %665 = vmatprep.subr.mxu0 %v408_v20  ;;  %v324_v63 = vld [vmem:[%s1934_s23 + $0x8] sm:$0xff]  ;;  %v451_v0 = vld [vmem:[#allocation2 + $0x300] sm:$0xff]  ;;  %v514_v3 = vld [vmem:[#allocation2 + $0x4f8] sm:$0xff] }
  0x4c   : > { %754 = vmatprep.subr.mxu1 %v472_v21  ;;  %666 = vmatpush2.msra.mxu0 %v407_v22  ;;  %v323_v1 = vld [vmem:[%s1934_s23] sm:$0xff]  ;;  %v578_v4 = vld [vmem:[#allocation2 + $0x6f8] sm:$0xff]  ;;  %v325_v5 = vld [vmem:[%s1934_s23 + $0x10] sm:$0xff] }
  0x4d   : > { %755 = vmatpush2.msra.mxu1 %v471_v23  ;;  %667 = vmatprep.subr.mxu0 %v406_v24  ;;  %v513_v6 = vld [vmem:[#allocation2 + $0x4f0] sm:$0xff]  ;;  %v512_v8 = vld [vmem:[#allocation2 + $0x4e8] sm:$0xff]  ;;  %v511_v10 = vld [vmem:[#allocation2 + $0x4e0] sm:$0xff] }
  0x4e   : > { %756 = vmatprep.subr.mxu1 %v470_v25  ;;  %668 = vmatpush2.msra.mxu0 %v405_v26  ;;  %v577_v7 = vld [vmem:[#allocation2 + $0x6f0] sm:$0xff]  ;;  %v576_v9 = vld [vmem:[#allocation2 + $0x6e8] sm:$0xff]  ;;  %v575_v11 = vld [vmem:[#allocation2 + $0x6e0] sm:$0xff] }
  0x4f   : > { %757 = vmatpush2.msra.mxu1 %v469_v27  ;;  %669 = vmatprep.subr.mxu0 %v404_v28  ;;  %v510_v12 = vld [vmem:[#allocation2 + $0x4d8] sm:$0xff]  ;;  %v509_v14 = vld [vmem:[#allocation2 + $0x4d0] sm:$0xff]  ;;  %v508_v16 = vld [vmem:[#allocation2 + $0x4c8] sm:$0xff] }
  0x50   : > { %758 = vmatprep.subr.mxu1 %v468_v29  ;;  %670 = vmatpush2.msra.mxu0 %v403_v30  ;;  %v574_v13 = vld [vmem:[#allocation2 + $0x6d8] sm:$0xff]  ;;  %v573_v15 = vld [vmem:[#allocation2 + $0x6d0] sm:$0xff]  ;;  %v572_v17 = vld [vmem:[#allocation2 + $0x6c8] sm:$0xff] }
  0x51   : > { %759 = vmatpush2.msra.mxu1 %v467_v31  ;;  %671 = vmatprep.subr.mxu0 %v402_v32  ;;  %v507_v18 = vld [vmem:[#allocation2 + $0x4c0] sm:$0xff]  ;;  %v506_v20 = vld [vmem:[#allocation2 + $0x4b8] sm:$0xff]  ;;  %v505_v22 = vld [vmem:[#allocation2 + $0x4b0] sm:$0xff] }
  0x52   : > { %760 = vmatprep.subr.mxu1 %v466_v33  ;;  %672 = vmatpush2.msra.mxu0 %v401_v34  ;;  %v571_v19 = vld [vmem:[#allocation2 + $0x6c0] sm:$0xff]  ;;  %v570_v21 = vld [vmem:[#allocation2 + $0x6b8] sm:$0xff]  ;;  %v569_v23 = vld [vmem:[#allocation2 + $0x6b0] sm:$0xff] }
  0x53   : > { %761 = vmatpush2.msra.mxu1 %v465_v35  ;;  %673 = vmatprep.subr.mxu0 %v400_v36  ;;  %v504_v24 = vld [vmem:[#allocation2 + $0x4a8] sm:$0xff]  ;;  %v503_v26 = vld [vmem:[#allocation2 + $0x4a0] sm:$0xff]  ;;  %v502_v28 = vld [vmem:[#allocation2 + $0x498] sm:$0xff] }
  0x54   : > { %762 = vmatprep.subr.mxu1 %v464_v37  ;;  %674 = vmatpush2.msra.mxu0 %v399_v38  ;;  %v568_v25 = vld [vmem:[#allocation2 + $0x6a8] sm:$0xff]  ;;  %v567_v27 = vld [vmem:[#allocation2 + $0x6a0] sm:$0xff]  ;;  %v566_v29 = vld [vmem:[#allocation2 + $0x698] sm:$0xff] }
  0x55   : > { %763 = vmatpush2.msra.mxu1 %v463_v39  ;;  %675 = vmatprep.subr.mxu0 %v398_v40  ;;  %v501_v30 = vld [vmem:[#allocation2 + $0x490] sm:$0xff]  ;;  %v500_v32 = vld [vmem:[#allocation2 + $0x488] sm:$0xff]  ;;  %v499_v34 = vld [vmem:[#allocation2 + $0x480] sm:$0xff] }
  0x56   : > { %764 = vmatprep.subr.mxu1 %v462_v41  ;;  %676 = vmatpush2.msra.mxu0 %v397_v42  ;;  %v565_v31 = vld [vmem:[#allocation2 + $0x690] sm:$0xff]  ;;  %v564_v33 = vld [vmem:[#allocation2 + $0x688] sm:$0xff]  ;;  %v563_v35 = vld [vmem:[#allocation2 + $0x680] sm:$0xff] }
  0x57   : > { %765 = vmatpush2.msra.mxu1 %v461_v43  ;;  %677 = vmatprep.subr.mxu0 %v396_v44  ;;  %v498_v36 = vld [vmem:[#allocation2 + $0x478] sm:$0xff]  ;;  %v497_v38 = vld [vmem:[#allocation2 + $0x470] sm:$0xff]  ;;  %v496_v40 = vld [vmem:[#allocation2 + $0x468] sm:$0xff] }
  0x58   : > { %766 = vmatprep.subr.mxu1 %v460_v45  ;;  %678 = vmatpush2.msra.mxu0 %v395_v46  ;;  %v562_v37 = vld [vmem:[#allocation2 + $0x678] sm:$0xff]  ;;  %v561_v39 = vld [vmem:[#allocation2 + $0x670] sm:$0xff]  ;;  %v560_v41 = vld [vmem:[#allocation2 + $0x668] sm:$0xff] }
  0x59   : > { %767 = vmatpush2.msra.mxu1 %v459_v47  ;;  %679 = vmatprep.subr.mxu0 %v394_v48  ;;  %v495_v42 = vld [vmem:[#allocation2 + $0x460] sm:$0xff]  ;;  %v494_v44 = vld [vmem:[#allocation2 + $0x458] sm:$0xff]  ;;  %v493_v46 = vld [vmem:[#allocation2 + $0x450] sm:$0xff] }
  0x5a   : > { %768 = vmatprep.subr.mxu1 %v458_v49  ;;  %680 = vmatpush2.msra.mxu0 %v393_v50  ;;  %v559_v43 = vld [vmem:[#allocation2 + $0x660] sm:$0xff]  ;;  %v558_v45 = vld [vmem:[#allocation2 + $0x658] sm:$0xff]  ;;  %v557_v47 = vld [vmem:[#allocation2 + $0x650] sm:$0xff] }
  0x5b   : > { %769 = vmatpush2.msra.mxu1 %v457_v51  ;;  %681 = vmatprep.subr.mxu0 %v392_v52  ;;  %v492_v48 = vld [vmem:[#allocation2 + $0x448] sm:$0xff]  ;;  %v491_v50 = vld [vmem:[#allocation2 + $0x440] sm:$0xff]  ;;  %v490_v52 = vld [vmem:[#allocation2 + $0x438] sm:$0xff] }
  0x5c   : > { %770 = vmatprep.subr.mxu1 %v456_v53  ;;  %682 = vmatpush2.msra.mxu0 %v391_v54  ;;  %v556_v49 = vld [vmem:[#allocation2 + $0x648] sm:$0xff]  ;;  %v555_v51 = vld [vmem:[#allocation2 + $0x640] sm:$0xff]  ;;  %v554_v53 = vld [vmem:[#allocation2 + $0x638] sm:$0xff] }
  0x5d   : > { %771 = vmatpush2.msra.mxu1 %v455_v55  ;;  %683 = vmatprep.subr.mxu0 %v390_v56  ;;  %v489_v54 = vld [vmem:[#allocation2 + $0x430] sm:$0xff]  ;;  %v488_v56 = vld [vmem:[#allocation2 + $0x428] sm:$0xff] }
  0x5e   : > { %772 = vmatprep.subr.mxu1 %v454_v57  ;;  %684 = vmatpush2.msra.mxu0 %v389_v58  ;;  %v553_v55 = vld [vmem:[#allocation2 + $0x630] sm:$0xff]  ;;  %v552_v57 = vld [vmem:[#allocation2 + $0x628] sm:$0xff]  ;;  %v487_v58 = vld [vmem:[#allocation2 + $0x420] sm:$0xff] }
  0x5f   : > { %773 = vmatpush2.msra.mxu1 %v453_v59  ;;  %685 = vmatprep.subr.mxu0 %v388_v60  ;;  %v551_v59 = vld [vmem:[#allocation2 + $0x620] sm:$0xff]  ;;  %v486_v60 = vld [vmem:[#allocation2 + $0x418] sm:$0xff] }
  0x60   : > { %774 = vmatprep.subr.mxu1 %v452_v61  ;;  %686 = vmatpush2.msra.mxu0 %v387_v62  ;;  %v550_v61 = vld [vmem:[#allocation2 + $0x618] sm:$0xff]  ;;  %v485_v62 = vld [vmem:[#allocation2 + $0x410] sm:$0xff] }
  0x61   : > { %687 = vmatprep.mubr.f32.mxu0 %v324_v63  ;;  %775 = vmatpush2.msra.mxu1 %v451_v0  ;;  %v549_v63 = vld [vmem:[#allocation2 + $0x610] sm:$0xff]  ;;  %v484_v0 = vld [vmem:[#allocation2 + $0x408] sm:$0xff] }
  0x62   : > { %688 = vmatmul.mubr.f32.vlgmr.msra.gmra.mxu0 %v323_v1  ;;  %776 = vmatprep.mubr.f32.mxu1 %v326_v2  ;;  %v548_v1 = vld [vmem:[#allocation2 + $0x608] sm:$0xff]  ;;  %v483_v2 = vld [vmem:[#allocation2 + $0x400] sm:$0xff] }
  0x63   : > { %801 = vmatprep.subr.mxu0 %v514_v3  ;;  %890 = vmatprep.subr.mxu1 %v578_v4  ;;  %v547_v3 = vld [vmem:[#allocation2 + $0x600] sm:$0xff]  ;;  %v546_v4 = vld [vmem:[#allocation2 + $0x5f8] sm:$0xff] }
  0x64   : > { %777 = vmatmul.mubr.f32.vlgmr.msra.gmra.mxu1 %v325_v5  ;;  %802 = vmatpush1.msra.mxu0 %v513_v6  ;;  %v610_v5 = vld [vmem:[#allocation2 + $0x7f8] sm:$0xff]  ;;  %v545_v6 = vld [vmem:[#allocation2 + $0x5f0] sm:$0xff] }
  0x65   : > { %891 = vmatpush1.msra.mxu1 %v577_v7  ;;  %803 = vmatprep.subr.mxu0 %v512_v8  ;;  %v609_v7 = vld [vmem:[#allocation2 + $0x7f0] sm:$0xff]  ;;  %v544_v8 = vld [vmem:[#allocation2 + $0x5e8] sm:$0xff] }
  0x66   : > { %892 = vmatprep.subr.mxu1 %v576_v9  ;;  %804 = vmatpush1.msra.mxu0 %v511_v10  ;;  %v608_v9 = vld [vmem:[#allocation2 + $0x7e8] sm:$0xff]  ;;  %v543_v10 = vld [vmem:[#allocation2 + $0x5e0] sm:$0xff] }
  0x67   : > { %893 = vmatpush1.msra.mxu1 %v575_v11  ;;  %805 = vmatprep.subr.mxu0 %v510_v12  ;;  %v607_v11 = vld [vmem:[#allocation2 + $0x7e0] sm:$0xff]  ;;  %v542_v12 = vld [vmem:[#allocation2 + $0x5d8] sm:$0xff] }
  0x68   : > { %894 = vmatprep.subr.mxu1 %v574_v13  ;;  %806 = vmatpush1.msra.mxu0 %v509_v14  ;;  %v606_v13 = vld [vmem:[#allocation2 + $0x7d8] sm:$0xff]  ;;  %v541_v14 = vld [vmem:[#allocation2 + $0x5d0] sm:$0xff] }
  0x69   : > { %895 = vmatpush1.msra.mxu1 %v573_v15  ;;  %807 = vmatprep.subr.mxu0 %v508_v16  ;;  %v605_v15 = vld [vmem:[#allocation2 + $0x7d0] sm:$0xff]  ;;  %v540_v16 = vld [vmem:[#allocation2 + $0x5c8] sm:$0xff] }
  0x6a   : > { %896 = vmatprep.subr.mxu1 %v572_v17  ;;  %808 = vmatpush1.msra.mxu0 %v507_v18  ;;  %v604_v17 = vld [vmem:[#allocation2 + $0x7c8] sm:$0xff]  ;;  %v539_v18 = vld [vmem:[#allocation2 + $0x5c0] sm:$0xff] }
  0x6b   : > { %897 = vmatpush1.msra.mxu1 %v571_v19  ;;  %809 = vmatprep.subr.mxu0 %v506_v20  ;;  %v603_v19 = vld [vmem:[#allocation2 + $0x7c0] sm:$0xff]  ;;  %v538_v20 = vld [vmem:[#allocation2 + $0x5b8] sm:$0xff] }
  0x6c   : > { %898 = vmatprep.subr.mxu1 %v570_v21  ;;  %810 = vmatpush1.msra.mxu0 %v505_v22  ;;  %v602_v21 = vld [vmem:[#allocation2 + $0x7b8] sm:$0xff]  ;;  %v537_v22 = vld [vmem:[#allocation2 + $0x5b0] sm:$0xff] }
  0x6d   : > { %899 = vmatpush1.msra.mxu1 %v569_v23  ;;  %811 = vmatprep.subr.mxu0 %v504_v24  ;;  %v601_v23 = vld [vmem:[#allocation2 + $0x7b0] sm:$0xff]  ;;  %v536_v24 = vld [vmem:[#allocation2 + $0x5a8] sm:$0xff] }
  0x6e   : > { %900 = vmatprep.subr.mxu1 %v568_v25  ;;  %812 = vmatpush1.msra.mxu0 %v503_v26  ;;  %v600_v25 = vld [vmem:[#allocation2 + $0x7a8] sm:$0xff]  ;;  %v535_v26 = vld [vmem:[#allocation2 + $0x5a0] sm:$0xff] }
  0x6f   : > { %901 = vmatpush1.msra.mxu1 %v567_v27  ;;  %813 = vmatprep.subr.mxu0 %v502_v28  ;;  %v599_v27 = vld [vmem:[#allocation2 + $0x7a0] sm:$0xff]  ;;  %v534_v28 = vld [vmem:[#allocation2 + $0x598] sm:$0xff] }
  0x70   : > { %902 = vmatprep.subr.mxu1 %v566_v29  ;;  %814 = vmatpush1.msra.mxu0 %v501_v30  ;;  %v598_v29 = vld [vmem:[#allocation2 + $0x798] sm:$0xff]  ;;  %v533_v30 = vld [vmem:[#allocation2 + $0x590] sm:$0xff] }
  0x71   : > { %903 = vmatpush1.msra.mxu1 %v565_v31  ;;  %815 = vmatprep.subr.mxu0 %v500_v32  ;;  %v597_v31 = vld [vmem:[#allocation2 + $0x790] sm:$0xff]  ;;  %v532_v32 = vld [vmem:[#allocation2 + $0x588] sm:$0xff] }
  0x72   : > { %904 = vmatprep.subr.mxu1 %v564_v33  ;;  %816 = vmatpush1.msra.mxu0 %v499_v34  ;;  %v596_v33 = vld [vmem:[#allocation2 + $0x788] sm:$0xff]  ;;  %v531_v34 = vld [vmem:[#allocation2 + $0x580] sm:$0xff] }
  0x73   : > { %905 = vmatpush1.msra.mxu1 %v563_v35  ;;  %817 = vmatprep.subr.mxu0 %v498_v36  ;;  %v595_v35 = vld [vmem:[#allocation2 + $0x780] sm:$0xff]  ;;  %v530_v36 = vld [vmem:[#allocation2 + $0x578] sm:$0xff] }
  0x74   : > { %906 = vmatprep.subr.mxu1 %v562_v37  ;;  %818 = vmatpush1.msra.mxu0 %v497_v38  ;;  %v594_v37 = vld [vmem:[#allocation2 + $0x778] sm:$0xff]  ;;  %v332_v38 = vld [vmem:[%s1934_s23 + $0x48] sm:$0xff] }
  0x75   : > { %907 = vmatpush1.msra.mxu1 %v561_v39  ;;  %819 = vmatprep.subr.mxu0 %v496_v40  ;;  %v529_v39 = vld [vmem:[#allocation2 + $0x570] sm:$0xff] }
  0x76   : > { %908 = vmatprep.subr.mxu1 %v560_v41  ;;  %820 = vmatpush1.msra.mxu0 %v495_v42  ;;  %v593_v40 = vld [vmem:[#allocation2 + $0x770] sm:$0xff]  ;;  %v331_v41 = vld [vmem:[%s1934_s23 + $0x40] sm:$0xff]  ;;  %v528_v42 = vld [vmem:[#allocation2 + $0x568] sm:$0xff] }
  0x77   : > { %909 = vmatpush1.msra.mxu1 %v559_v43  ;;  %821 = vmatprep.subr.mxu0 %v494_v44  ;;  %v592_v43 = vld [vmem:[#allocation2 + $0x768] sm:$0xff]  ;;  %v334_v44 = vld [vmem:[%s1934_s23 + $0x58] sm:$0xff] }
  0x78   : > { %910 = vmatprep.subr.mxu1 %v558_v45  ;;  %822 = vmatpush1.msra.mxu0 %v493_v46  ;;  %v527_v45 = vld [vmem:[#allocation2 + $0x560] sm:$0xff] }
  0x79   : > { %911 = vmatpush1.msra.mxu1 %v557_v47  ;;  %823 = vmatprep.subr.mxu0 %v492_v48  ;;  %v591_v46 = vld [vmem:[#allocation2 + $0x760] sm:$0xff]  ;;  %v526_v47 = vld [vmem:[#allocation2 + $0x558] sm:$0xff]  ;;  %v333_v48 = vld [vmem:[%s1934_s23 + $0x50] sm:$0xff] }
  0x7a   : > { %912 = vmatprep.subr.mxu1 %v556_v49  ;;  %824 = vmatpush1.msra.mxu0 %v491_v50  ;;  %v590_v49 = vld [vmem:[#allocation2 + $0x758] sm:$0xff]  ;;  %v340_v50 = vld [vmem:[%s1934_s23 + $0x88] sm:$0xff] }
  0x7b   : > { %913 = vmatpush1.msra.mxu1 %v555_v51  ;;  %825 = vmatprep.subr.mxu0 %v490_v52  ;;  %v525_v51 = vld [vmem:[#allocation2 + $0x550] sm:$0xff] }
  0x7c   : > { %914 = vmatprep.subr.mxu1 %v554_v53  ;;  %826 = vmatpush1.msra.mxu0 %v489_v54  ;;  %v589_v52 = vld [vmem:[#allocation2 + $0x750] sm:$0xff]  ;;  %v339_v53 = vld [vmem:[%s1934_s23 + $0x80] sm:$0xff]  ;;  %v524_v54 = vld [vmem:[#allocation2 + $0x548] sm:$0xff] }
  0x7d   : > { %915 = vmatpush1.msra.mxu1 %v553_v55  ;;  %827 = vmatprep.subr.mxu0 %v488_v56  ;;  %v588_v55 = vld [vmem:[#allocation2 + $0x748] sm:$0xff]  ;;  %v342_v56 = vld [vmem:[%s1934_s23 + $0x98] sm:$0xff] }
  0x7e   : > { %916 = vmatprep.subr.mxu1 %v552_v57  ;;  %828 = vmatpush1.msra.mxu0 %v487_v58  ;;  %v523_v57 = vld [vmem:[#allocation2 + $0x540] sm:$0xff] }
  0x7f   : > { %917 = vmatpush1.msra.mxu1 %v551_v59  ;;  %829 = vmatprep.subr.mxu0 %v486_v60  ;;  %v587_v58 = vld [vmem:[#allocation2 + $0x740] sm:$0xff]  ;;  %v522_v59 = vld [vmem:[#allocation2 + $0x538] sm:$0xff]  ;;  %v341_v60 = vld [vmem:[%s1934_s23 + $0x90] sm:$0xff] }
  0x80   : > { %918 = vmatprep.subr.mxu1 %v550_v61  ;;  %830 = vmatpush1.msra.mxu0 %v485_v62  ;;  %v586_v61 = vld [vmem:[#allocation2 + $0x738] sm:$0xff]  ;;  %v348_v62 = vld [vmem:[%s1934_s23 + $0xc8] sm:$0xff] }
  0x81   : > { %919 = vmatpush1.msra.mxu1 %v549_v63  ;;  %831 = vmatprep.subr.mxu0 %v484_v0  ;;  %v521_v63 = vld [vmem:[#allocation2 + $0x530] sm:$0xff] }
  0x82   : > { %920 = vmatprep.subr.mxu1 %v548_v1  ;;  %832 = vmatpush1.msra.mxu0 %v483_v2  ;;  %v585_v0 = vld [vmem:[#allocation2 + $0x730] sm:$0xff]  ;;  %v347_v1 = vld [vmem:[%s1934_s23 + $0xc0] sm:$0xff]  ;;  %v520_v2 = vld [vmem:[#allocation2 + $0x528] sm:$0xff] }
  0x83   : > { %921 = vmatpush1.msra.mxu1 %v547_v3  ;;  %833 = vmatprep.subr.mxu0 %v546_v4  ;;  %v584_v3 = vld [vmem:[#allocation2 + $0x728] sm:$0xff]  ;;  %v350_v4 = vld [vmem:[%s1934_s23 + $0xd8] sm:$0xff] }
  0x84   : > { %922 = vmatprep.subr.mxu1 %v610_v5  ;;  %834 = vmatpush2.msra.mxu0 %v545_v6  ;;  %v519_v5 = vld [vmem:[#allocation2 + $0x520] sm:$0xff] }
  0x85   : > { %923 = vmatpush2.msra.mxu1 %v609_v7  ;;  %835 = vmatprep.subr.mxu0 %v544_v8  ;;  %v583_v6 = vld [vmem:[#allocation2 + $0x720] sm:$0xff]  ;;  %v518_v7 = vld [vmem:[#allocation2 + $0x518] sm:$0xff]  ;;  %v349_v8 = vld [vmem:[%s1934_s23 + $0xd0] sm:$0xff] }
  0x86   : > { %924 = vmatprep.subr.mxu1 %v608_v9  ;;  %836 = vmatpush2.msra.mxu0 %v543_v10  ;;  %v582_v9 = vld [vmem:[#allocation2 + $0x718] sm:$0xff]  ;;  %v517_v10 = vld [vmem:[#allocation2 + $0x510] sm:$0xff] }
  0x87   : > { %925 = vmatpush2.msra.mxu1 %v607_v11  ;;  %837 = vmatprep.subr.mxu0 %v542_v12  ;;  %v581_v11 = vld [vmem:[#allocation2 + $0x710] sm:$0xff]  ;;  %v516_v12 = vld [vmem:[#allocation2 + $0x508] sm:$0xff] }
  0x88   : > { %926 = vmatprep.subr.mxu1 %v606_v13  ;;  %838 = vmatpush2.msra.mxu0 %v541_v14  ;;  %v580_v13 = vld [vmem:[#allocation2 + $0x708] sm:$0xff]  ;;  %v515_v14 = vld [vmem:[#allocation2 + $0x500] sm:$0xff] }
  0x89   : > { %927 = vmatpush2.msra.mxu1 %v605_v15  ;;  %839 = vmatprep.subr.mxu0 %v540_v16  ;;  %v328_v15 = vld [vmem:[%s1934_s23 + $0x28] sm:$0xff]  ;;  %v579_v16 = vld [vmem:[#allocation2 + $0x700] sm:$0xff] }
  0x8a   : > { %928 = vmatprep.subr.mxu1 %v604_v17  ;;  %840 = vmatpush2.msra.mxu0 %v539_v18  ;;  %v330_v17 = vld [vmem:[%s1934_s23 + $0x38] sm:$0xff]  ;;  %v327_v18 = vld [vmem:[%s1934_s23 + $0x20] sm:$0xff] }
  0x8b   : > { %929 = vmatpush2.msra.mxu1 %v603_v19  ;;  %841 = vmatprep.subr.mxu0 %v538_v20  ;;  %v329_v19 = vld [vmem:[%s1934_s23 + $0x30] sm:$0xff]  ;;  %v336_v20 = vld [vmem:[%s1934_s23 + $0x68] sm:$0xff] }
  0x8c   : > { %930 = vmatprep.subr.mxu1 %v602_v21  ;;  %842 = vmatpush2.msra.mxu0 %v537_v22  ;;  %v338_v21 = vld [vmem:[%s1934_s23 + $0x78] sm:$0xff] }
  0x8d   : > { %931 = vmatpush2.msra.mxu1 %v601_v23  ;;  %843 = vmatprep.subr.mxu0 %v536_v24  ;;  %v1034_v22 = vld [vmem:[%s2167_s3 + $0xf8] sm:$0xff]  ;;  %v335_v24 = vld [vmem:[%s1934_s23 + $0x60] sm:$0xff] }
  0x8e   : > { %932 = vmatprep.subr.mxu1 %v600_v25  ;;  %844 = vmatpush2.msra.mxu0 %v535_v26  ;;  %v1018_v23 = vld [vmem:[%s2167_s3 + $0x78] sm:$0xff]  ;;  %v337_v25 = vld [vmem:[%s1934_s23 + $0x70] sm:$0xff]  ;;  %v344_v26 = vld [vmem:[%s1934_s23 + $0xa8] sm:$0xff] }
  0x8f   : > { %933 = vmatpush2.msra.mxu1 %v599_v27  ;;  %845 = vmatprep.subr.mxu0 %v534_v28  ;;  %v346_v27 = vld [vmem:[%s1934_s23 + $0xb8] sm:$0xff]  ;;  %v1033_v28 = vld [vmem:[%s2167_s3 + $0xf0] sm:$0xff] }
  0x90   : > { %934 = vmatprep.subr.mxu1 %v598_v29  ;;  %846 = vmatpush2.msra.mxu0 %v533_v30  ;;  %v1017_v29 = vld [vmem:[%s2167_s3 + $0x70] sm:$0xff]  ;;  %v343_v30 = vld [vmem:[%s1934_s23 + $0xa0] sm:$0xff] }
  0x91   : > { %935 = vmatpush2.msra.mxu1 %v597_v31  ;;  %847 = vmatprep.subr.mxu0 %v532_v32  ;;  %v345_v31 = vld [vmem:[%s1934_s23 + $0xb0] sm:$0xff]  ;;  %v352_v32 = vld [vmem:[%s1934_s23 + $0xe8] sm:$0xff] }
  0x92   : > { %936 = vmatprep.subr.mxu1 %v596_v33  ;;  %848 = vmatpush2.msra.mxu0 %v531_v34  ;;  %v354_v33 = vld [vmem:[%s1934_s23 + $0xf8] sm:$0xff]  ;;  %v1032_v34 = vld [vmem:[%s2167_s3 + $0xe8] sm:$0xff] }
  0x93   : > { %937 = vmatpush2.msra.mxu1 %v595_v35  ;;  %849 = vmatprep.subr.mxu0 %v530_v36  ;;  %v1016_v35 = vld [vmem:[%s2167_s3 + $0x68] sm:$0xff]  ;;  %v351_v36 = vld [vmem:[%s1934_s23 + $0xe0] sm:$0xff] }
  0x94   : > { %938 = vmatprep.subr.mxu1 %v594_v37  ;;  %693 = vmatprep.mubr.f32.mxu0 %v332_v38  ;;  %v353_v37 = vld [vmem:[%s1934_s23 + $0xf0] sm:$0xff]  ;;  %v1031_v38 = vld [vmem:[%s2167_s3 + $0xe0] sm:$0xff] }
  0x95   : > { %850 = vmatpush2.msra.mxu0 %v529_v39  ;;  %939 = vmatpush2.msra.mxu1 %v593_v40  ;;  %v1015_v39 = vld [vmem:[%s2167_s3 + $0x60] sm:$0xff]  ;;  %v1030_v40 = vld [vmem:[%s2167_s3 + $0xd8] sm:$0xff] }
  0x96   : > { %694 = vmatmul.mubr.f32.gmra.mxu0 %v331_v41  ;;  %851 = vmatprep.subr.mxu0 %v528_v42  ;;  %v1014_v41 = vld [vmem:[%s2167_s3 + $0x58] sm:$0xff]  ;;  %v1029_v42 = vld [vmem:[%s2167_s3 + $0xd0] sm:$0xff] }
  0x97   : > { %940 = vmatprep.subr.mxu1 %v592_v43  ;;  %782 = vmatprep.mubr.f32.mxu1 %v334_v44  ;;  %v1013_v43 = vld [vmem:[%s2167_s3 + $0x50] sm:$0xff]  ;;  %v1028_v44 = vld [vmem:[%s2167_s3 + $0xc8] sm:$0xff] }
  0x98   : > { %852 = vmatpush2.msra.mxu0 %v527_v45  ;;  %941 = vmatpush2.msra.mxu1 %v591_v46  ;;  %v1012_v45 = vld [vmem:[%s2167_s3 + $0x48] sm:$0xff]  ;;  %v1027_v46 = vld [vmem:[%s2167_s3 + $0xc0] sm:$0xff] }
  0x99   : > { %853 = vmatprep.subr.mxu0 %v526_v47  ;;  %783 = vmatmul.mubr.f32.gmra.mxu1 %v333_v48  ;;  %v1011_v47 = vld [vmem:[%s2167_s3 + $0x40] sm:$0xff]  ;;  %v1026_v48 = vld [vmem:[%s2167_s3 + $0xb8] sm:$0xff] }
  0x9a   : > { %942 = vmatprep.subr.mxu1 %v590_v49  ;;  %699 = vmatprep.mubr.f32.mxu0 %v340_v50  ;;  %v1010_v49 = vld [vmem:[%s2167_s3 + $0x38] sm:$0xff]  ;;  %v1025_v50 = vld [vmem:[%s2167_s3 + $0xb0] sm:$0xff] }
  0x9b   : > { %854 = vmatpush2.msra.mxu0 %v525_v51  ;;  %943 = vmatpush2.msra.mxu1 %v589_v52  ;;  %v1009_v51 = vld [vmem:[%s2167_s3 + $0x30] sm:$0xff]  ;;  %v1024_v52 = vld [vmem:[%s2167_s3 + $0xa8] sm:$0xff] }
  0x9c   : > { %700 = vmatmul.mubr.f32.gmra.mxu0 %v339_v53  ;;  %855 = vmatprep.subr.mxu0 %v524_v54  ;;  %v1008_v53 = vld [vmem:[%s2167_s3 + $0x28] sm:$0xff]  ;;  %v1023_v54 = vld [vmem:[%s2167_s3 + $0xa0] sm:$0xff] }
  0x9d   : > { %944 = vmatprep.subr.mxu1 %v588_v55  ;;  %788 = vmatprep.mubr.f32.mxu1 %v342_v56  ;;  %v1007_v55 = vld [vmem:[%s2167_s3 + $0x20] sm:$0xff]  ;;  %v1022_v56 = vld [vmem:[%s2167_s3 + $0x98] sm:$0xff] }
  0x9e   : > { %856 = vmatpush2.msra.mxu0 %v523_v57  ;;  %945 = vmatpush2.msra.mxu1 %v587_v58  ;;  %v1006_v57 = vld [vmem:[%s2167_s3 + $0x18] sm:$0xff]  ;;  %v1021_v58 = vld [vmem:[%s2167_s3 + $0x90] sm:$0xff] }
  0x9f   : > { %857 = vmatprep.subr.mxu0 %v522_v59  ;;  %789 = vmatmul.mubr.f32.gmra.mxu1 %v341_v60  ;;  %v1005_v59 = vld [vmem:[%s2167_s3 + $0x10] sm:$0xff]  ;;  %v1020_v60 = vld [vmem:[%s2167_s3 + $0x88] sm:$0xff] }
  0xa0   : > { %946 = vmatprep.subr.mxu1 %v586_v61  ;;  %705 = vmatprep.mubr.f32.mxu0 %v348_v62  ;;  %v1004_v61 = vld [vmem:[%s2167_s3 + $0x8] sm:$0xff]  ;;  %v1019_v62 = vld [vmem:[%s2167_s3 + $0x80] sm:$0xff] }
  0xa1   : > { %858 = vmatpush2.msra.mxu0 %v521_v63  ;;  %947 = vmatpush2.msra.mxu1 %v585_v0  ;;  %v1003_v63 = vld [vmem:[%s2167_s3] sm:$0xff]  ;;  %v1146_v0 = vld [vmem:[%s2169_s5 + $0x38] sm:$0xff] }
  0xa2   : > { %706 = vmatmul.mubr.f32.gmra.mxu0 %v347_v1  ;;  %859 = vmatprep.subr.mxu0 %v520_v2 }
  0xa3   : > { %948 = vmatprep.subr.mxu1 %v584_v3  ;;  %794 = vmatprep.mubr.f32.mxu1 %v350_v4  ;;  %v613_v4 = vlaneseq }
  0xa4   : > { %860 = vmatpush2.msra.mxu0 %v519_v5  ;;  %949 = vmatpush2.msra.mxu1 %v583_v6 }
  0xa5   : > { %861 = vmatprep.subr.mxu0 %v518_v7  ;;  %795 = vmatmul.mubr.f32.gmra.mxu1 %v349_v8  ;;  %v614_v8 = vshrl.u32 %v613_v4, 7 }
  0xa6   : > { %950 = vmatprep.subr.mxu1 %v582_v9  ;;  %862 = vmatpush2.msra.mxu0 %v517_v10 }
  0xa7   : > { %951 = vmatpush2.msra.mxu1 %v581_v11  ;;  %863 = vmatprep.subr.mxu0 %v516_v12  ;;  %v615_v12 = vsub.s32 0, %v614_v8 }
  0xa8   : > { %952 = vmatprep.subr.mxu1 %v580_v13  ;;  %864 = vmatpush2.msra.mxu0 %v515_v14  ;;  %v611_v13 = vld [vmem:[%s2166_s2] sm:$0x3]  ;;  %v619_v14 = vsub.s32 1, %v614_v8 }
  0xa9   : > { %865 = vmatprep.mubr.f32.mxu0 %v328_v15  ;;  %953 = vmatpush2.msra.mxu1 %v579_v16 }
  0xaa   : > { %954 = vmatprep.mubr.f32.mxu1 %v330_v17  ;;  %866 = vmatmul.mubr.f32.vlgmr.msra.gmra.mxu0 %v327_v18  ;;  %v616_v17 = vrot.slane %v611_v13, %v615_v12 }
  0xab   : > { %955 = vmatmul.mubr.f32.vlgmr.msra.gmra.mxu1 %v329_v19  ;;  %871 = vmatprep.mubr.f32.mxu0 %v336_v20  ;;  %v620_v19 = vrot.slane %v611_v13, %v619_v14 }
  0xac   : > { %960 = vmatprep.mubr.f32.mxu1 %v338_v21  ;;  %1534 = vmatprep.subr.mxu0 %v1034_v22 }
  0xad   : > { %1535 = vmatpush3.msra.mxu0 %v1018_v23  ;;  %1590 = vmatprep.subr.mxu1 %v1146_v0 }
  0xae   : > { %872 = vmatmul.mubr.f32.gmra.mxu0 %v335_v24  ;;  %1536 = vmatprep.subr.mxu0 %v1033_v28 }
  0xaf   : > { %961 = vmatmul.mubr.f32.gmra.mxu1 %v337_v25  ;;  %877 = vmatprep.mubr.f32.mxu0 %v344_v26 }
  0xb0   : > { %966 = vmatprep.mubr.f32.mxu1 %v346_v27  ;;  %1537 = vmatpush3.msra.mxu0 %v1017_v29 }
  0xb1   : > { %1538 = vmatprep.subr.mxu0 %v1032_v34  ;;  %1591 = vmatpush3.msra.mxu1 %v1146_v0 }
  0xb2   : > { %878 = vmatmul.mubr.f32.gmra.mxu0 %v343_v30 }
  0xb3   : > { %967 = vmatmul.mubr.f32.gmra.mxu1 %v345_v31  ;;  %883 = vmatprep.mubr.f32.mxu0 %v352_v32 }
  0xb4   : > { %972 = vmatprep.mubr.f32.mxu1 %v354_v33  ;;  %1539 = vmatpush3.msra.mxu0 %v1016_v35 }
  0xb5   : > { %1540 = vmatprep.subr.mxu0 %v1031_v38 }
  0xb6   : > { %884 = vmatmul.mubr.f32.gmra.mxu0 %v351_v36 }
  0xb7   : > { %973 = vmatmul.mubr.f32.gmra.mxu1 %v353_v37  ;;  %1541 = vmatpush3.msra.mxu0 %v1015_v39 }
  0xb8   : > { %1542 = vmatprep.subr.mxu0 %v1030_v40 }
  0xb9   : > { %1543 = vmatpush3.msra.mxu0 %v1014_v41 }
  0xba   : > { %1544 = vmatprep.subr.mxu0 %v1029_v42 }
  0xbb   : > { %1545 = vmatpush3.msra.mxu0 %v1013_v43 }
  0xbc   : > { %1546 = vmatprep.subr.mxu0 %v1028_v44 }
  0xbd   : > { %1547 = vmatpush3.msra.mxu0 %v1012_v45 }
  0xbe   : > { %1548 = vmatprep.subr.mxu0 %v1027_v46 }
  0xbf   : > { %1549 = vmatpush3.msra.mxu0 %v1011_v47 }
  0xc0   : > { %1550 = vmatprep.subr.mxu0 %v1026_v48 }
  0xc1   : > { %1551 = vmatpush3.msra.mxu0 %v1010_v49 }
  0xc2   : > { %1552 = vmatprep.subr.mxu0 %v1025_v50 }
  0xc3   : > { %1553 = vmatpush3.msra.mxu0 %v1009_v51 }
  0xc4   : > { %1554 = vmatprep.subr.mxu0 %v1024_v52 }
  0xc5   : > { %1555 = vmatpush3.msra.mxu0 %v1008_v53 }
  0xc6   : > { %1556 = vmatprep.subr.mxu0 %v1023_v54 }
  0xc7   : > { %1557 = vmatpush3.msra.mxu0 %v1007_v55 }
  0xc8   : > { %1558 = vmatprep.subr.mxu0 %v1022_v56 }
  0xc9   : > { %1559 = vmatpush3.msra.mxu0 %v1006_v57 }
  0xca   : > { %1560 = vmatprep.subr.mxu0 %v1021_v58 }
  0xcb   : > { %1561 = vmatpush3.msra.mxu0 %v1005_v59 }
  0xcc   : > { %1562 = vmatprep.subr.mxu0 %v1020_v60 }
  0xcd   : > { %1563 = vmatpush3.msra.mxu0 %v1004_v61 }
  0xce   : > { %1564 = vmatprep.subr.mxu0 %v1019_v62 }
  0xcf   : > { %1565 = vmatpush3.msra.mxu0 %v1003_v63 }
 0x122   : > { %v689_v1 = vpop.f32.mrf.mxu0 }
 0x123   : > { %v690_v21 = vadd.f32 %v689_v1, %v616_v17 }
 0x124   : > { %v778_v2 = vpop.f32.mrf.mxu1  ;;  %v691_v3 = vpop.f32.mrf.mxu0 }
 0x125   : > { %v692_v23 = vadd.f32 %v691_v3, %v620_v19  ;;  %v779_v26 = vadd.f32 %v778_v2, %v690_v21 }
 0x126   : > { %v780_v6 = vpop.f32.mrf.mxu1 }
 0x127   : > { %v781_v30 = vadd.f32 %v780_v6, %v692_v23 }
 0x156   : > { %v695_v5 = vpop.f32.mrf.mxu0 }
 0x157   : > { %v696_v27 = vadd.f32 %v695_v5, %v616_v17 }
 0x158   : > { %v697_v7 = vpop.f32.mrf.mxu0 }
 0x159   : > { %v784_v9 = vpop.f32.mrf.mxu1  ;;  %v698_v31 = vadd.f32 %v697_v7, %v620_v19 }
 0x15a   : > { %v785_v36 = vadd.f32 %v784_v9, %v696_v27  ;;  %v1142_v27 = vld [vmem:[%s2169_s5 + $0x18] sm:$0xff] }
 0x15b   : > { %v786_v10 = vpop.f32.mrf.mxu1 }
 0x15c   : > { %v701_v11 = vpop.f32.mrf.mxu0  ;;  %v787_v42 = vadd.f32 %v786_v10, %v698_v31 }
 0x15d   : > { %v702_v33 = vadd.f32 %v701_v11, %v616_v17 }
 0x15e   : > { %v703_v16 = vpop.f32.mrf.mxu0 }
 0x15f   : > { %v790_v15 = vpop.f32.mrf.mxu1  ;;  %v704_v39 = vadd.f32 %v703_v16, %v620_v19 }
 0x160   : > { %v791_v45 = vadd.f32 %v790_v15, %v702_v33 }
 0x161   : > { %v792_v18 = vpop.f32.mrf.mxu1 }
 0x162   : > { %v707_v20 = vpop.f32.mrf.mxu0  ;;  %v793_v53 = vadd.f32 %v792_v18, %v704_v39 }
 0x163   : > { %v708_v46 = vadd.f32 %v707_v20, %v616_v17 }
 0x164   : > { %v709_v25 = vpop.f32.mrf.mxu0 }
 0x165   : > { %v796_v22 = vpop.f32.mrf.mxu1  ;;  %v710_v56 = vadd.f32 %v709_v25, %v620_v19  ;;  %v1144_v25 = vld [vmem:[%s2169_s5 + $0x28] sm:$0xff] }
 0x166   : > { %v797_v60 = vadd.f32 %v796_v22, %v708_v46 }
 0x167   : > { %v798_v24 = vpop.f32.mrf.mxu1 }
 0x168   : > { %v799_v6 = vadd.f32 %v798_v24, %v710_v56  ;;  %v1145_v24 = vld [vmem:[%s2169_s5 + $0x30] sm:$0xff]  ;;  %v1508_v56 = vld [vmem:[%s2170_s6] ss:$0 sm:$0xff] }
 0x169   : > { %1592 = vmatprep.subr.mxu1 %v1145_v24 }
 0x16a   : > { %v867_v28 = vpop.f32.mrf.mxu0  ;;  %1593 = vmatpush3.msra.mxu1 %v1145_v24 }
 0x16b   : > { %v956_v29 = vpop.f32.mrf.mxu1  ;;  %v868_v32 = vadd.f32 %v867_v28, %v779_v26  ;;  %1594 = vmatprep.subr.mxu1 %v1144_v25  ;;  %v1143_v26 = vld [vmem:[%s2169_s5 + $0x20] sm:$0xff]  ;;  %v1141_v28 = vld [vmem:[%s2169_s5 + $0x10] sm:$0xff] }
 0x16c   : > { %v869_v34 = vpop.f32.mrf.mxu0  ;;  %1595 = vmatpush3.msra.mxu1 %v1144_v25 }
 0x16d   : > { %v958_v35 = vpop.f32.mrf.mxu1  ;;  %v957_v37 = vadd.f32 %v956_v29, %v868_v32  ;;  %v870_v38 = vadd.f32 %v869_v34, %v781_v30  ;;  %1596 = vmatprep.subr.mxu1 %v1143_v26  ;;  %v1140_v29 = vld [vmem:[%s2169_s5 + $0x8] sm:$0xff]  ;;  %v1139_v30 = vld [vmem:[%s2169_s5] sm:$0xff] }
 0x16e   : > { %v873_v40 = vpop.f32.mrf.mxu0  ;;  %1597 = vmatpush3.msra.mxu1 %v1143_v26  ;;  %v1507_v32 = vld [vmem:[%s2168_s4] ss:$0 sm:$0xff] }
 0x16f   : > { %v962_v41 = vpop.f32.mrf.mxu1  ;;  %v959_v43 = vadd.f32 %v958_v35, %v870_v38  ;;  %v874_v44 = vadd.f32 %v873_v40, %v785_v36  ;;  %v987_v47 = vmul.f32 0.2, %v957_v37  ;;  %vm979_vm0 = vcmp.gt.f32.partialorder %v957_v37, 0.0  ;;  %1598 = vmatprep.subr.mxu1 %v1142_v27 }
 0x170   : > { %v875_v48 = vpop.f32.mrf.mxu0  ;;  %1599 = vmatpush3.msra.mxu1 %v1142_v27 }
 0x171   : > { %v964_v49 = vpop.f32.mrf.mxu1  ;;  %v988_v50 = vmul.f32 0.2, %v959_v43  ;;  %v963_v51 = vadd.f32 %v962_v41, %v874_v44  ;;  %v876_v52 = vadd.f32 %v875_v48, %v787_v42  ;;  %vm980_vm1 = vcmp.gt.f32.partialorder %v959_v43, 0.0  ;;  %1600 = vmatprep.subr.mxu1 %v1141_v28 }
 0x172   : > { %v879_v54 = vpop.f32.mrf.mxu0  ;;  %v995_v61 = vsel %vm979_vm0, %v957_v37, %v987_v47  ;;  %1601 = vmatpush3.msra.mxu1 %v1141_v28 }
 0x173   : > { %v968_v55 = vpop.f32.mrf.mxu1  ;;  %v965_v57 = vadd.f32 %v964_v49, %v876_v52  ;;  %v880_v58 = vadd.f32 %v879_v54, %v791_v45  ;;  %v996_v59 = vsel %vm980_vm1, %v959_v43, %v988_v50  ;;  %v989_v62 = vmul.f32 0.2, %v963_v51  ;;  %1602 = vmatprep.subr.mxu1 %v1140_v29 }
 0x174   : > { %v881_v63 = vpop.f32.mrf.mxu0  ;;  %1106 = vmatprep.mubr.f32.mxu0 %v996_v59  ;;  %vm981_vm2 = vcmp.gt.f32.partialorder %v963_v51, 0.0  ;;  %1603 = vmatpush3.msra.mxu1 %v1140_v29 }
 0x175   : > { %v970_v0 = vpop.f32.mrf.mxu1  ;;  %v990_v1 = vmul.f32 0.2, %v965_v57  ;;  %v969_v2 = vadd.f32 %v968_v55, %v880_v58  ;;  %v882_v3 = vadd.f32 %v881_v63, %v793_v53  ;;  %1107 = vmatmul.mubr.f32.vlgmr.msra.gmra.mxu0 %v995_v61  ;;  %vm982_vm3 = vcmp.gt.f32.partialorder %v965_v57, 0.0  ;;  %1604 = vmatprep.subr.mxu1 %v1139_v30 }
 0x176   : > { %v885_v4 = vpop.f32.mrf.mxu0  ;;  %v997_v12 = vsel %vm981_vm2, %v963_v51, %v989_v62  ;;  %1605 = vmatpush3.msra.mxu1 %v1139_v30 }
 0x177   : > { %v974_v5 = vpop.f32.mrf.mxu1  ;;  %v971_v7 = vadd.f32 %v970_v0, %v882_v3  ;;  %v886_v8 = vadd.f32 %v885_v4, %v797_v60  ;;  %v998_v9 = vsel %vm982_vm3, %v965_v57, %v990_v1  ;;  %v991_v10 = vmul.f32 0.2, %v969_v2 }
 0x178   : > { %v887_v11 = vpop.f32.mrf.mxu0  ;;  %1111 = vmatprep.mubr.f32.mxu0 %v998_v9  ;;  %vm983_vm4 = vcmp.gt.f32.partialorder %v969_v2, 0.0 }
 0x179   : > { %v992_v13 = vmul.f32 0.2, %v971_v7  ;;  %v975_v14 = vadd.f32 %v974_v5, %v886_v8  ;;  %v888_v15 = vadd.f32 %v887_v11, %v799_v6  ;;  %1112 = vmatmul.mubr.f32.gmra.mxu0 %v997_v12  ;;  %vm984_vm5 = vcmp.gt.f32.partialorder %v971_v7, 0.0  ;;  %v976_v16 = vpop.f32.mrf.mxu1 }
 0x17a   : > { %v999_v20 = vsel %vm983_vm4, %v969_v2, %v991_v10 }
 0x17b   : > { %v977_v17 = vadd.f32 %v976_v16, %v888_v15  ;;  %v1000_v18 = vsel %vm984_vm5, %v971_v7, %v992_v13  ;;  %v993_v19 = vmul.f32 0.2, %v975_v14  ;;  %vm985_vm7 = vcmp.gt.f32.partialorder %v975_v14, 0.0 }
 0x17c   : > { %1116 = vmatprep.mubr.f32.mxu0 %v1000_v18 }
 0x17d   : > { %v994_v21 = vmul.f32 0.2, %v977_v17  ;;  %1117 = vmatmul.mubr.f32.gmra.mxu0 %v999_v20  ;;  %vm986_vm6 = vcmp.gt.f32.partialorder %v977_v17, 0.0  ;;  %v1001_v23 = vsel %vm985_vm7, %v975_v14, %v993_v19 }
 0x17f   : > { %v1002_v22 = vsel %vm986_vm6, %v977_v17, %v994_v21 }
 0x180   : > { %1121 = vmatprep.mubr.f32.mxu0 %v1002_v22 }
 0x181   : > { %1122 = vmatmul.mubr.f32.gmra.mxu0 %v1001_v23 }
 0x235   : > { %v1566_v31 = vpop.f32.mrf.mxu0 }
 0x237   : > { %v1567_v33 = vpop.f32.mrf.mxu0 }
 0x238   : > { %v1568_v34 = vadd.f32 %v1567_v33, %v1566_v31 }
 0x239   : > { %v1569_v35 = vpop.f32.mrf.mxu0 }
 0x23a   : > { %v1109_v36 = vadd.f32 %v1568_v34, %v1507_v32 }
 0x23b   : > { %v1570_v37 = vpop.f32.mrf.mxu0 }
 0x23c   : > { %v1131_v38 = vmul.f32 0.2, %v1109_v36  ;;  %v1571_v39 = vadd.f32 %v1570_v37, %v1569_v35  ;;  %vm1127_vm8 = vcmp.gt.f32.partialorder %v1109_v36, 0.0 }
 0x23d   : > { %v1572_v40 = vpop.f32.mrf.mxu0 }
 0x23e   : > { %v1114_v41 = vadd.f32 %v1571_v39, %v1507_v32  ;;  %v1135_v42 = vsel %vm1127_vm8, %v1109_v36, %v1131_v38 }
 0x23f   : > { %v1573_v43 = vpop.f32.mrf.mxu0  ;;  %1606 = vmatprep.mubr.msk.f32.mxu1 %vm1154_vm9, %v1135_v42 }
 0x240   : > { %vm1128_vm10 = vcmp.gt.f32.partialorder %v1114_v41, 0.0  ;;  %v1132_v44 = vmul.f32 0.2, %v1114_v41  ;;  %v1574_v45 = vadd.f32 %v1573_v43, %v1572_v40 }
 0x241   : > { %v1575_v46 = vpop.f32.mrf.mxu0 }
 0x242   : > { %v1136_v47 = vsel %vm1128_vm10, %v1114_v41, %v1132_v44  ;;  %v1119_v48 = vadd.f32 %v1574_v45, %v1507_v32 }
 0x243   : > { %v1576_v49 = vpop.f32.mrf.mxu0  ;;  %1607 = vmatmul.mubr.msk.f32.vlgmr.msra.gmra.mxu1 %vm1154_vm9, %v1136_v47 }
 0x244   : > { %v1133_v50 = vmul.f32 0.2, %v1119_v48  ;;  %v1577_v51 = vadd.f32 %v1576_v49, %v1575_v46  ;;  %vm1129_vm11 = vcmp.gt.f32.partialorder %v1119_v48, 0.0 }
 0x246   : > { %v1124_v52 = vadd.f32 %v1577_v51, %v1507_v32  ;;  %v1137_v53 = vsel %vm1129_vm11, %v1119_v48, %v1133_v50 }
 0x247   : > { %1609 = vmatprep.mubr.msk.f32.mxu1 %vm1154_vm9, %v1137_v53 }
 0x248   : > { %v1134_v54 = vmul.f32 0.2, %v1124_v52  ;;  %vm1130_vm12 = vcmp.gt.f32.partialorder %v1124_v52, 0.0 }
 0x24a   : > { %v1138_v55 = vsel %vm1130_vm12, %v1124_v52, %v1134_v54 }
 0x24b   : > { %1610 = vmatmul.mubr.msk.f32.gmra.mxu1 %vm1154_vm9, %v1138_v55 }
 0x303   : > { %v1608_v57 = vpop.f32.mrf.mxu1 }
 0x304   : > { %v1239_v58 = vadd.f32 %v1608_v57, %v1508_v56 }
 0x305   : > { %v1233_v59 = vpop.f32.mrf.mxu1 }
 0x306   : > { %1254 = vst.msk [vmem:[%s2102_s15 + $0x8] sm:$0xff] %vm1252_vm13, %v1239_v58  ;;  %v1234_v60 = vadd.f32 %v1508_v56, %v1233_v59 }
 0x308   : > { %1253 = vst.msk [vmem:[%s2102_s15] sm:$0xff] %vm1252_vm13, %v1234_v60 }
 0x30b   : > { %v1611_v61 = vpop.f32.mrf.mxu1 }
 0x30c   : > { %v1249_v62 = vadd.f32 %v1611_v61, %v1508_v56  ;;  %1263 = sbr.rel (!%p1899_p4) target bundleno = 824 (0x338), region = 56 }
 0x30d   : > { %v1243_v63 = vpop.f32.mrf.mxu1 }
 0x30e   : > { %1256 = vst.msk [vmem:[%s2102_s15 + $0x18] sm:$0xff] %vm1252_vm13, %v1249_v62  ;;  %v1244_v0 = vadd.f32 %v1508_v56, %v1243_v63 }
 0x310   : > { %1255 = vst.msk [vmem:[%s2102_s15 + $0x10] sm:$0xff] %vm1252_vm13, %v1244_v0 }
 0x311   : > { %s2181_s24 = smov (!%p1266_p6, %s1265_s24), 4 }
 0x312   : > { %s1515_s21 = sshll.u32 %s2181_s24, 7 }
 0x313   : > { %p1518_p7 = scmp.eq.s32.totalorder %s1515_s21, 0 }
 0x314   : > { %s2121_s22 = sshrl.u32 (!%p1518_p7), %s2181_s24, 2 }
 0x315   : > { %1274 = sbr.rel (%p1518_p7) target bundleno = 824 (0x338), region = 60  ;;  %p1519_p4 = scmp.le.s32.totalorder (!%p1518_p7), %s2121_s22, 0 }
 0x31a   : > { %1444 = sbr.rel (%p1519_p4) target bundleno = 807 (0x327), region = 137  ;;  %s2174_s27 = smov (!%p1519_p4), %s2115_s20 }
 0x31b   : > { %s2175_s9 = smov (!%p1519_p4), %s2102_s15  ;;  %s2130_s18 = smov (!%p1519_p4), 0  }
 0x31c   : > { %s1811_s26 = smov (!%p1519_p4), 0  }
 0x31f LB: >> { %v1343_v1 = vld [vmem:[%s1805_s9] sm:$0xff]  ;;  %v1345_v2 = vld [vmem:[%s1805_s9 + $0x8] sm:$0xff]  ;;  %v1347_v3 = vld [vmem:[%s1805_s9 + $0x10] sm:$0xff]  ;;  %s1351_s29 = sadd.s32 1, %s1809_s18  ;;  %s1337_s26 = sadd.s32 1, %s1813_s26   ;;  %s1813_s26 = sphi %s1811_s26, %s1337_s26   ;;  %s1809_s18 = sphi %s2130_s18, %s2176_s18   ;;  %s1805_s9 = sphi %s2175_s9, %s1356_s9   ;;  %s1801_s27 = sphi %s2174_s27, %s1357_s27  }
 0x320   : >> { %1344 = vst [vmem:[%s1801_s27] sm:$0xff] %v1343_v1  ;;  %1346 = vst [vmem:[%s1801_s27 + $0x8] sm:$0xff] %v1345_v2  ;;  %v1349_v4 = vld [vmem:[%s1805_s9 + $0x18] sm:$0xff]  ;;  %p1352_p8 = scmp.ge.s32.totalorder %s1351_s29, %s2121_s22  ;;  %p1336_p9 = scmp.ge.s32.totalorder %s1337_s26, %s2121_s22 }
 0x321   : >> { %1348 = vst [vmem:[%s1801_s27 + $0x10] sm:$0xff] %v1347_v3  ;;  %1350 = vst [vmem:[%s1801_s27 + $0x18] sm:$0xff] %v1349_v4 }
 0x322   : >> { %s2183_s29 = smov (%p1352_p8, %s1351_s29), 0  ;;  %1339 = sbr.rel (!%p1336_p9) target bundleno = 799 (0x31f), region = 143 }
 0x323   : >> { %s1520_s30 = sshll.u32 %s2183_s29, 5  ;;  %s2176_s18 = smov %s2183_s29 }
 0x324   : >> { %s1356_s9 = scalar_lea.vmem %s2102_s15, %s1520_s30 [#allocation4]   ;;  %s1357_s27 = scalar_lea.vmem %s2115_s20, %s1520_s30  }
 0x327 PF: > { %s2146_s23 = sand.u32 3, %s2181_s24   ;;  %s1532_s10 = sshll.u32 %s2121_s22, 5 }
 0x328   : > { %s1362_s11 = scalar_lea.vmem %s2102_s15, %s1532_s10 [#allocation4]   ;;  %s1364_s12 = scalar_lea.vmem %s2115_s20, %s1532_s10  }
 0x329   : > { %p1525_p10 = scmp.le.s32.totalorder %s2146_s23, 0 }
 0x32a   : > { %s1815_s13 = smov (!%p1525_p10), %s1364_s12   ;;  %s1819_s14 = smov (!%p1525_p10), %s1362_s11  }
 0x32b   : > { %1458 = sbr.rel (%p1525_p10) target bundleno = 824 (0x338), region = 148  ;;  %s1823_s16 = smov (!%p1525_p10), 0  }
 0x32c   : > { %s1827_s17 = smov (!%p1525_p10), 0  }
 0x330 LB: >> { %v1374_v5 = vld [vmem:[%s1821_s14] sm:$0xff]  ;;  %s1376_s24 = sadd.s32 1, %s1825_s16  ;;  %s1368_s17 = sadd.s32 1, %s1829_s17   ;;  %s1829_s17 = sphi %s1827_s17, %s1368_s17   ;;  %s1825_s16 = sphi %s1823_s16, %s1824_s16   ;;  %s1821_s14 = sphi %s1819_s14, %s1381_s14   ;;  %s1817_s13 = sphi %s1815_s13, %s1382_s13  }
 0x331   : >> { %1375 = vst [vmem:[%s1817_s13] sm:$0xff] %v1374_v5  ;;  %p1377_p11 = scmp.ge.s32.totalorder %s1376_s24, %s2146_s23  ;;  %p1367_p12 = scmp.ge.s32.totalorder %s1368_s17, %s2146_s23 }
 0x333   : >> { %s2185_s24 = smov (%p1377_p11, %s1376_s24), 0  ;;  %1370 = sbr.rel (!%p1367_p12) target bundleno = 816 (0x330), region = 154 }
 0x334   : >> { %s1526_s15 = sshll.u32 %s2185_s24, 3  ;;  %s1824_s16 = smov %s2185_s24  }
 0x335   : >> { %s1381_s14 = scalar_lea.vmem %s1362_s11, %s1526_s15 [#allocation4]   ;;  %s1382_s13 = scalar_lea.vmem %s1364_s12, %s1526_s15  }
 0x338 PF: > { %p15_p13 = scmp.ge.s32.totalorder %s1889_s28, 4   ;;  %s2177_s24 = smov %s1793_s25 }
 0x339   : > { %s2178_s25 = smov %s1897_s8  ;;  %s2179_s26 = smov %s1889_s28 }
 0x33a   :  { %17 = sbr.rel (!%p15_p13) target bundleno = 2 (0x2), region = 165 }
 0x33f   :  { %1398 = vsyncpa [#allocation3], 1 }
 0x340   :  { %1400 = vsyncpa [#allocation3 + $0x1], 1 }

</bundles_post_ra>
